<compile_context>
chip_gen: v6e
topology: v6e:2x2x1
jax: 0.10.0
libtpu: 0.0.40
codegen_flags: <defaults>
</compile_context>

<pallas_src>
import functools

import jax
import jax.numpy as jnp
from jax.experimental import pallas as pl
from jax.experimental.pallas import tpu as pltpu

LEAKY_SLOPE = 0.1
BN_EPS = 1e-5


# ------------------------------ fused kernel ---------------------------------


def _fused_repeat_kernel(x_ref, above_ref, below_ref, w1_ref, b1_ref,
                         w3_ref, b2_ref, o_ref, h_scr, *, use_residual):
    # x_ref:     (1, tH, W, C)     current spatial tile of x (NHWC)
    # above_ref: (1, 1, W, C)      x row just above the tile (zeros at image top)
    # below_ref: (1, 1, W, C)      x row just below the tile (zeros at image bottom)
    # w1_ref:    (C, Cmid)         1x1 conv weight, BN1 scale folded in
    # b1_ref:    (1, Cmid)         BN1 folded bias (f32)
    # w3_ref:    (3, 3, Cmid, C)   3x3 conv weight (HWIO), BN2 scale folded in
    # b2_ref:    (1, C)            BN2 folded bias (f32)
    # o_ref:     (1, tH, W, C)
    # h_scr:     (tH+2, W+2, Cmid) zero-padded intermediate h, VMEM only
    t = pl.program_id(1)
    n_t = pl.num_programs(1)
    tile_h = o_ref.shape[1]
    w = o_ref.shape[2]
    c_out = o_ref.shape[3]
    c_mid = w1_ref.shape[1]

    w1 = w1_ref[...]
    b1 = b1_ref[0]            # (Cmid,) f32
    b2 = b2_ref[0]            # (C,)    f32

    # ---- stage 1: 1x1 conv + BN + LeakyReLU over tile + 1-row halo ----------
    # Single MXU matmul with M = (tH+2)*W rows (halo rows included), instead of
    # one main dot plus two tiny halo dots.
    x_tile = x_ref[0]                                        # (tH, W, C)
    x_ext = jnp.concatenate([above_ref[0], x_tile, below_ref[0]], axis=0)
    z = jax.lax.dot_general(
        x_ext, w1,
        dimension_numbers=(((2,), (0,)), ((), ())),
        preferred_element_type=jnp.float32)                  # (tH+2, W, Cmid)
    z = z + b1
    h_ext = jnp.maximum(z, LEAKY_SLOPE * z)                  # f32

    # The 3x3 conv zero-pads h, so at the image borders the halo rows of h are
    # zeros (NOT conv applied to zero rows of x).
    h_top = jnp.where(t > 0, h_ext[0:1], 0.0)                # (1, W, Cmid)
    h_bot = jnp.where(t < n_t - 1, h_ext[tile_h + 1:tile_h + 2], 0.0)
    h_main = h_ext[1:tile_h + 1]                             # (tH, W, Cmid)

    # Assemble the zero-padded h tile in VMEM scratch (never touches HBM).
    zcol = jnp.zeros((tile_h + 2, 1, c_mid), h_scr.dtype)
    h_scr[:, 0:1, :] = zcol                                  # left pad column
    h_scr[:, w + 1:w + 2, :] = zcol                          # right pad column
    h_scr[0:1, 1:w + 1, :] = h_top.astype(h_scr.dtype)
    h_scr[1:tile_h + 1, 1:w + 1, :] = h_main.astype(h_scr.dtype)
    h_scr[tile_h + 1:tile_h + 2, 1:w + 1, :] = h_bot.astype(h_scr.dtype)

    # ---- stage 2: 3x3 conv (pad=1) + BN + LeakyReLU (+ residual) ------------
    w3 = w3_ref[...]                                         # (3, 3, Cmid, C)
    # NOTE: for Cmid >= 128 the nine K=Cmid dots below could be packed into a
    # single im2col matmul (K = 9*Cmid) for better MXU contraction fill; with
    # narrow Cmid the lane-axis repacking costs more than it saves, so keep
    # nine accumulating dots.  Patches are read straight from the scratch ref
    # (static windows) rather than slicing a materialized value.
    acc = jnp.zeros((tile_h, w, c_out), jnp.float32)
    for ky in range(3):
        for kx in range(3):
            patch = h_scr[ky:ky + tile_h, kx:kx + w, :]      # (tH, W, Cmid)
            acc = acc + jax.lax.dot_general(
                patch, w3[ky, kx],
                dimension_numbers=(((2,), (0,)), ((), ())),
                preferred_element_type=jnp.float32)

    y = acc + b2
    y = jnp.maximum(y, LEAKY_SLOPE * y)
    if use_residual:
        y = y + x_tile.astype(jnp.float32)                   # residual add in f32
    o_ref[0] = y.astype(o_ref.dtype)


# ---------------------------- pallas_call wrapper -----------------------------


def _pick_tile_h(h, w, c_in, c_mid, itemsize, vmem_budget_bytes=8 << 20):
    """Largest divisor of H whose per-step VMEM footprint fits the budget,
    preferring >= 2 tiles along H so the BlockSpec pipeline can overlap."""
    def step_bytes(th):
        xin = (th + 2) * w * c_in * itemsize                # x tile + halo rows
        out = th * w * c_in * itemsize                      # output tile
        scr = (th + 2) * (w + 2) * c_mid * itemsize         # padded h scratch
        hreg = (th + 2) * w * c_mid * 4                     # f32 h_ext value
        fac = th * w * c_in * 4                             # f32 accumulator
        return 2 * (xin + out) + scr + hreg + fac           # I/O double-buffered

    divisors = [d for d in range(1, h + 1) if h % d == 0]
    fitting = [d for d in divisors if step_bytes(d) <= vmem_budget_bytes] or [1]
    th = max(fitting)
    if th == h and len(fitting) > 1:
        th = max(d for d in fitting if d < h)               # keep >= 2 grid steps on H
    return th


def fused_residual_repeat(x, w1, b1, w3, b2, *, use_residual, tile_h=None):
    """One ResidualBlock repeat on NHWC x: [x +] leaky(bn2(conv3x3(leaky(bn1(conv1x1(x))))))."""
    n, h, w, c = x.shape
    c_mid = w1.shape[1]
    if tile_h is None:
        tile_h = _pick_tile_h(h, w, c, c_mid, jnp.dtype(x.dtype).itemsize)
    assert h % tile_h == 0, (h, tile_h)
    n_th = h // tile_h

    w1 = w1.astype(x.dtype)
    w3 = w3.astype(x.dtype)
    b1 = b1.astype(jnp.float32)
    b2 = b2.astype(jnp.float32)

    # Rows just above/below every H-tile (zeros at the image borders).  These
    # are tiny strided row gathers that replace a full HBM-padded copy of h.
    zero_row = jnp.zeros((n, 1, w, c), x.dtype)
    above = jnp.concatenate([zero_row, x[:, tile_h - 1:h - 1:tile_h]], axis=1)
    below = jnp.concatenate([x[:, tile_h::tile_h], zero_row], axis=1)

    kernel = functools.partial(_fused_repeat_kernel, use_residual=use_residual)
    return pl.pallas_call(
        kernel,
        out_shape=jax.ShapeDtypeStruct((n, h, w, c), x.dtype),
        grid_spec=pltpu.PrefetchScalarGridSpec(
            num_scalar_prefetch=0,
            grid=(n, n_th),
            in_specs=[
                pl.BlockSpec((1, tile_h, w, c), lambda i, t: (i, t, 0, 0)),
                pl.BlockSpec((1, 1, w, c), lambda i, t: (i, t, 0, 0)),
                pl.BlockSpec((1, 1, w, c), lambda i, t: (i, t, 0, 0)),
                pl.BlockSpec((c, c_mid), lambda i, t: (0, 0)),
                pl.BlockSpec((1, c_mid), lambda i, t: (0, 0)),
                pl.BlockSpec((3, 3, c_mid, c), lambda i, t: (0, 0, 0, 0)),
                pl.BlockSpec((1, c), lambda i, t: (0, 0)),
            ],
            out_specs=pl.BlockSpec((1, tile_h, w, c), lambda i, t: (i, t, 0, 0)),
            scratch_shapes=[pltpu.VMEM((tile_h + 2, w + 2, c_mid), x.dtype)],
        ),
        compiler_params=pltpu.CompilerParams(
            dimension_semantics=("parallel", "parallel")),
    )(x, above, below, w1, b1, w3, b2)


# --------------------------- parameters & module ------------------------------


def _fold_bn_into_conv(w, gamma, beta, mean, var):
    # Inference-mode BN folded into the conv weight: y = (x * w_folded) + bias.
    scale = gamma * jax.lax.rsqrt(var + BN_EPS)
    w_folded = w * scale                                    # broadcasts over Cout (last axis)
    bias = (beta - mean * scale).reshape(1, -1).astype(jnp.float32)
    return w_folded, bias


def make_residual_block_params(key, channels, num_repeats):
    mid = channels // 2
    params = []
    for _ in range(num_repeats):
        keys = jax.random.split(key, 11)
        key = keys[0]
        w1 = 0.1 * jax.random.normal(keys[1], (channels, mid), jnp.float32)
        g1 = 1.0 + 0.05 * jax.random.normal(keys[2], (mid,), jnp.float32)
        be1 = 0.05 * jax.random.normal(keys[3], (mid,), jnp.float32)
        m1 = 0.05 * jax.random.normal(keys[4], (mid,), jnp.float32)
        v1 = 1.0 + 0.1 * jnp.abs(jax.random.normal(keys[5], (mid,), jnp.float32))
        w3 = 0.1 * jax.random.normal(keys[6], (3, 3, mid, channels), jnp.float32)
        g2 = 1.0 + 0.05 * jax.random.normal(keys[7], (channels,), jnp.float32)
        be2 = 0.05 * jax.random.normal(keys[8], (channels,), jnp.float32)
        m2 = 0.05 * jax.random.normal(keys[9], (channels,), jnp.float32)
        v2 = 1.0 + 0.1 * jnp.abs(jax.random.normal(keys[10], (channels,), jnp.float32))
        w1f, b1 = _fold_bn_into_conv(w1, g1, be1, m1, v1)
        w3f, b2 = _fold_bn_into_conv(w3, g2, be2, m2, v2)
        params.append(dict(w1=w1f, b1=b1, w3=w3f, b2=b2))
    return params


@functools.partial(jax.jit, static_argnames=("use_residual", "tile_h"))
def residual_block_forward(x_nchw, params, use_residual=True, tile_h=None):
    # PyTorch input is NCHW; kernels run in NHWC.
    x = jnp.transpose(x_nchw, (0, 2, 3, 1))                 # NCHW -> NHWC
    for p in params:
        x = fused_residual_repeat(x, p["w1"], p["b1"], p["w3"], p["b2"],
                                  use_residual=use_residual, tile_h=tile_h)
    return jnp.transpose(x, (0, 3, 1, 2))                   # NHWC -> NCHW


# ------------------------------ pure-JAX reference ----------------------------


def _reference_forward(x_nchw, params, use_residual=True):
    x = x_nchw
    hi = jax.lax.Precision.HIGHEST
    for p in params:
        w1 = jnp.transpose(p["w1"], (1, 0))[:, :, None, None]      # (Cmid, C, 1, 1)
        w3 = jnp.transpose(p["w3"], (3, 2, 0, 1))                  # (C, Cmid, 3, 3)
        h = jax.lax.conv_general_dilated(
            x, w1, (1, 1), "VALID",
            dimension_numbers=("NCHW", "OIHW", "NCHW"), precision=hi)
        h = h + p["b1"].reshape(1, -1, 1, 1)
        h = jnp.maximum(h, LEAKY_SLOPE * h)
        y = jax.lax.conv_general_dilated(
            h, w3, (1, 1), ((1, 1), (1, 1)),
            dimension_numbers=("NCHW", "OIHW", "NCHW"), precision=hi)
        y = y + p["b2"].reshape(1, -1, 1, 1)
        y = jnp.maximum(y, LEAKY_SLOPE * y)
        x = x + y if use_residual else y
    return x


# ----------------------------------- main --------------------------------------

if __name__ == "__main__":
    N, C, H, W = 2, 8, 16, 16
    num_repeats = 2

    root = jax.random.PRNGKey(0)
    k_x, k_p = jax.random.split(root)
    x = jax.random.normal(k_x, (N, C, H, W), jnp.float32)
    params = make_residual_block_params(k_p, C, num_repeats)

    y = residual_block_forward(x, params, use_residual=True)
    y = jax.block_until_ready(y)
    assert y.shape == (N, C, H, W), y.shape

    y_ref = _reference_forward(x, params, use_residual=True)
    err = float(jnp.max(jnp.abs(y - y_ref)))
    assert err < 2e-2, f"max abs error vs reference: {err}"

    print("KERNEL_OK")
</pallas_src>

<mosaic_0001>
module attributes {stable_mosaic.version = 11 : i64} {
  func.func @_fused_repeat_kernel(%arg0: i32, %arg1: i32, %arg2: memref<1x8x16x8xf32, #tpu.memory_space<vmem>>, %arg3: memref<1x1x16x8xf32, #tpu.memory_space<vmem>>, %arg4: memref<1x1x16x8xf32, #tpu.memory_space<vmem>>, %arg5: memref<8x4xf32, #tpu.memory_space<vmem>>, %arg6: memref<1x4xf32, #tpu.memory_space<vmem>>, %arg7: memref<3x3x4x8xf32, #tpu.memory_space<vmem>>, %arg8: memref<1x8xf32, #tpu.memory_space<vmem>>, %arg9: memref<1x8x16x8xf32, #tpu.memory_space<vmem>>, %arg10: memref<10x18x4xf32, #tpu.memory_space<vmem>>) attributes {dimension_semantics = [#tpu.dimension_semantics<parallel>, #tpu.dimension_semantics<parallel>], iteration_bounds = array<i64: 2, 2>, scalar_prefetch = 0 : i64, scratch_operands = 1 : i64, tpu.core_type = #tpu.core_type<tc>, window_params = [{transform_indices = @transform_0, window_bounds = array<i64: 1, 8, 16, 8>}, {transform_indices = @transform_1, window_bounds = array<i64: 1, 1, 16, 8>}, {transform_indices = @transform_2, window_bounds = array<i64: 1, 1, 16, 8>}, {pipeline_mode = #tpu.pipeline_mode<synchronous>, transform_indices = @transform_3, window_bounds = array<i64: 8, 4>}, {pipeline_mode = #tpu.pipeline_mode<synchronous>, transform_indices = @transform_4, window_bounds = array<i64: 1, 4>}, {pipeline_mode = #tpu.pipeline_mode<synchronous>, transform_indices = @transform_5, window_bounds = array<i64: 3, 3, 4, 8>}, {pipeline_mode = #tpu.pipeline_mode<synchronous>, transform_indices = @transform_6, window_bounds = array<i64: 1, 8>}, {transform_indices = @transform_7, window_bounds = array<i64: 1, 8, 16, 8>}]} {
    %c0 = arith.constant 0 : index
    %c0_0 = arith.constant 0 : index
    %0 = vector.load %arg5[%c0, %c0_0] : memref<8x4xf32, #tpu.memory_space<vmem>>, vector<8x4xf32>
    %c0_1 = arith.constant 0 : index
    %c0_2 = arith.constant 0 : index
    %1 = vector.load %arg6[%c0_1, %c0_2] : memref<1x4xf32, #tpu.memory_space<vmem>>, vector<1x4xf32>
    %2 = vector.shape_cast %1 : vector<1x4xf32> to vector<4xf32>
    %c0_3 = arith.constant 0 : index
    %c0_4 = arith.constant 0 : index
    %3 = vector.load %arg8[%c0_3, %c0_4] : memref<1x8xf32, #tpu.memory_space<vmem>>, vector<1x8xf32>
    %4 = vector.shape_cast %3 : vector<1x8xf32> to vector<8xf32>
    %c0_5 = arith.constant 0 : index
    %c0_6 = arith.constant 0 : index
    %c0_7 = arith.constant 0 : index
    %c0_8 = arith.constant 0 : index
    %5 = vector.load %arg2[%c0_5, %c0_6, %c0_7, %c0_8] : memref<1x8x16x8xf32, #tpu.memory_space<vmem>>, vector<1x8x16x8xf32>
    %6 = vector.shape_cast %5 : vector<1x8x16x8xf32> to vector<8x16x8xf32>
    %c0_9 = arith.constant 0 : index
    %c0_10 = arith.constant 0 : index
    %c0_11 = arith.constant 0 : index
    %c0_12 = arith.constant 0 : index
    %7 = vector.load %arg3[%c0_9, %c0_10, %c0_11, %c0_12] : memref<1x1x16x8xf32, #tpu.memory_space<vmem>>, vector<1x1x16x8xf32>
    %8 = vector.shape_cast %7 : vector<1x1x16x8xf32> to vector<1x16x8xf32>
    %c0_13 = arith.constant 0 : index
    %c0_14 = arith.constant 0 : index
    %c0_15 = arith.constant 0 : index
    %c0_16 = arith.constant 0 : index
    %9 = vector.load %arg4[%c0_13, %c0_14, %c0_15, %c0_16] : memref<1x1x16x8xf32, #tpu.memory_space<vmem>>, vector<1x1x16x8xf32>
    %10 = vector.shape_cast %9 : vector<1x1x16x8xf32> to vector<1x16x8xf32>
    %11 = tpu.concatenate %8, %6, %10 in 0 : vector<1x16x8xf32>, vector<8x16x8xf32>, vector<1x16x8xf32> -> vector<10x16x8xf32>
    %cst = arith.constant dense<0.000000e+00> : vector<10x16x4xf32>
    %12 = tpu.matmul %11, %0, %cst {dimension_numbers = #tpu.dot_dimension_numbers<[2], [0], [0, 1], [1], [0, 0, 0, 1, 1, 1], [], []>} : vector<10x16x8xf32>, vector<8x4xf32>, vector<10x16x4xf32> -> vector<10x16x4xf32>
    %13 = vector.shape_cast %2 : vector<4xf32> to vector<1x1x4xf32>
    %14 = vector.broadcast %13 : vector<1x1x4xf32> to vector<10x16x4xf32>
    %15 = arith.addf %12, %14 : vector<10x16x4xf32>
    %cst_17 = arith.constant 1.000000e-01 : f32
    %16 = vector.broadcast %cst_17 : f32 to vector<10x16x4xf32>
    %17 = arith.mulf %16, %15 : vector<10x16x4xf32>
    %18 = arith.maximumf %15, %17 : vector<10x16x4xf32>
    %c0_i32 = arith.constant 0 : i32
    %19 = arith.cmpi sgt, %arg1, %c0_i32 : i32
    %20 = vector.extract_strided_slice %18 {offsets = [0, 0, 0], sizes = [1, 16, 4], strides = [1, 1, 1]} : vector<10x16x4xf32> to vector<1x16x4xf32>
    %cst_18 = arith.constant 0.000000e+00 : f32
    %21 = vector.broadcast %cst_18 : f32 to vector<1x16x4xf32>
    %22 = arith.select %19, %20, %21 : vector<1x16x4xf32>
    %c1_i32 = arith.constant 1 : i32
    %23 = arith.cmpi slt, %arg1, %c1_i32 : i32
    %24 = vector.extract_strided_slice %18 {offsets = [9, 0, 0], sizes = [1, 16, 4], strides = [1, 1, 1]} : vector<10x16x4xf32> to vector<1x16x4xf32>
    %cst_19 = arith.constant 0.000000e+00 : f32
    %25 = vector.broadcast %cst_19 : f32 to vector<1x16x4xf32>
    %26 = arith.select %23, %24, %25 : vector<1x16x4xf32>
    %27 = vector.extract_strided_slice %18 {offsets = [1, 0, 0], sizes = [8, 16, 4], strides = [1, 1, 1]} : vector<10x16x4xf32> to vector<8x16x4xf32>
    %cst_20 = arith.constant 0.000000e+00 : f32
    %28 = vector.broadcast %cst_20 : f32 to vector<10x1x4xf32>
    %c0_21 = arith.constant 0 : index
    %c0_22 = arith.constant 0 : index
    %c0_23 = arith.constant 0 : index
    %29 = vector.load %arg10[%c0_21, %c0_22, %c0_23] : memref<10x18x4xf32, #tpu.memory_space<vmem>>, vector<10x1x4xf32>
    tpu.vector_store %arg10[%c0_21, %c0_22, %c0_23], %28 {strides = array<i32>} : memref<10x18x4xf32, #tpu.memory_space<vmem>>, vector<10x1x4xf32>,
    %c0_24 = arith.constant 0 : index
    %c17 = arith.constant 17 : index
    %c0_25 = arith.constant 0 : index
    %30 = vector.load %arg10[%c0_24, %c17, %c0_25] : memref<10x18x4xf32, #tpu.memory_space<vmem>>, vector<10x1x4xf32>
    tpu.vector_store %arg10[%c0_24, %c17, %c0_25], %28 {strides = array<i32>} : memref<10x18x4xf32, #tpu.memory_space<vmem>>, vector<10x1x4xf32>,
    %c0_26 = arith.constant 0 : index
    %c1 = arith.constant 1 : index
    %c0_27 = arith.constant 0 : index
    %31 = vector.load %arg10[%c0_26, %c1, %c0_27] : memref<10x18x4xf32, #tpu.memory_space<vmem>>, vector<1x16x4xf32>
    tpu.vector_store %arg10[%c0_26, %c1, %c0_27], %22 {strides = array<i32>} : memref<10x18x4xf32, #tpu.memory_space<vmem>>, vector<1x16x4xf32>,
    %c1_28 = arith.constant 1 : index
    %c1_29 = arith.constant 1 : index
    %c0_30 = arith.constant 0 : index
    %32 = vector.load %arg10[%c1_28, %c1_29, %c0_30] : memref<10x18x4xf32, #tpu.memory_space<vmem>>, vector<8x16x4xf32>
    tpu.vector_store %arg10[%c1_28, %c1_29, %c0_30], %27 {strides = array<i32>} : memref<10x18x4xf32, #tpu.memory_space<vmem>>, vector<8x16x4xf32>,
    %c9 = arith.constant 9 : index
    %c1_31 = arith.constant 1 : index
    %c0_32 = arith.constant 0 : index
    %33 = vector.load %arg10[%c9, %c1_31, %c0_32] : memref<10x18x4xf32, #tpu.memory_space<vmem>>, vector<1x16x4xf32>
    tpu.vector_store %arg10[%c9, %c1_31, %c0_32], %26 {strides = array<i32>} : memref<10x18x4xf32, #tpu.memory_space<vmem>>, vector<1x16x4xf32>,
    %c0_33 = arith.constant 0 : index
    %c0_34 = arith.constant 0 : index
    %c0_35 = arith.constant 0 : index
    %c0_36 = arith.constant 0 : index
    %34 = vector.load %arg7[%c0_33, %c0_34, %c0_35, %c0_36] : memref<3x3x4x8xf32, #tpu.memory_space<vmem>>, vector<3x3x4x8xf32>
    %cst_37 = arith.constant 0.000000e+00 : f32
    %35 = vector.broadcast %cst_37 : f32 to vector<8x16x8xf32>
    %c0_38 = arith.constant 0 : index
    %c0_39 = arith.constant 0 : index
    %c0_40 = arith.constant 0 : index
    %36 = vector.load %arg10[%c0_38, %c0_39, %c0_40] : memref<10x18x4xf32, #tpu.memory_space<vmem>>, vector<8x16x4xf32>
    %37 = vector.extract_strided_slice %34 {offsets = [0, 0, 0, 0], sizes = [1, 1, 4, 8], strides = [1, 1, 1, 1]} : vector<3x3x4x8xf32> to vector<1x1x4x8xf32>
    %38 = vector.shape_cast %37 : vector<1x1x4x8xf32> to vector<4x8xf32>
    %cst_41 = arith.constant dense<0.000000e+00> : vector<8x16x8xf32>
    %39 = tpu.matmul %36, %38, %cst_41 {dimension_numbers = #tpu.dot_dimension_numbers<[2], [0], [0, 1], [1], [0, 0, 0, 1, 1, 1], [], []>} : vector<8x16x4xf32>, vector<4x8xf32>, vector<8x16x8xf32> -> vector<8x16x8xf32>
    %40 = arith.addf %35, %39 : vector<8x16x8xf32>
    %c0_42 = arith.constant 0 : index
    %c1_43 = arith.constant 1 : index
    %c0_44 = arith.constant 0 : index
    %41 = vector.load %arg10[%c0_42, %c1_43, %c0_44] : memref<10x18x4xf32, #tpu.memory_space<vmem>>, vector<8x16x4xf32>
    %42 = vector.extract_strided_slice %34 {offsets = [0, 1, 0, 0], sizes = [1, 1, 4, 8], strides = [1, 1, 1, 1]} : vector<3x3x4x8xf32> to vector<1x1x4x8xf32>
    %43 = vector.shape_cast %42 : vector<1x1x4x8xf32> to vector<4x8xf32>
    %cst_45 = arith.constant dense<0.000000e+00> : vector<8x16x8xf32>
    %44 = tpu.matmul %41, %43, %cst_45 {dimension_numbers = #tpu.dot_dimension_numbers<[2], [0], [0, 1], [1], [0, 0, 0, 1, 1, 1], [], []>} : vector<8x16x4xf32>, vector<4x8xf32>, vector<8x16x8xf32> -> vector<8x16x8xf32>
    %45 = arith.addf %40, %44 : vector<8x16x8xf32>
    %c0_46 = arith.constant 0 : index
    %c2 = arith.constant 2 : index
    %c0_47 = arith.constant 0 : index
    %46 = vector.load %arg10[%c0_46, %c2, %c0_47] : memref<10x18x4xf32, #tpu.memory_space<vmem>>, vector<8x16x4xf32>
    %47 = vector.extract_strided_slice %34 {offsets = [0, 2, 0, 0], sizes = [1, 1, 4, 8], strides = [1, 1, 1, 1]} : vector<3x3x4x8xf32> to vector<1x1x4x8xf32>
    %48 = vector.shape_cast %47 : vector<1x1x4x8xf32> to vector<4x8xf32>
    %cst_48 = arith.constant dense<0.000000e+00> : vector<8x16x8xf32>
    %49 = tpu.matmul %46, %48, %cst_48 {dimension_numbers = #tpu.dot_dimension_numbers<[2], [0], [0, 1], [1], [0, 0, 0, 1, 1, 1], [], []>} : vector<8x16x4xf32>, vector<4x8xf32>, vector<8x16x8xf32> -> vector<8x16x8xf32>
    %50 = arith.addf %45, %49 : vector<8x16x8xf32>
    %c1_49 = arith.constant 1 : index
    %c0_50 = arith.constant 0 : index
    %c0_51 = arith.constant 0 : index
    %51 = vector.load %arg10[%c1_49, %c0_50, %c0_51] : memref<10x18x4xf32, #tpu.memory_space<vmem>>, vector<8x16x4xf32>
    %52 = vector.extract_strided_slice %34 {offsets = [1, 0, 0, 0], sizes = [1, 1, 4, 8], strides = [1, 1, 1, 1]} : vector<3x3x4x8xf32> to vector<1x1x4x8xf32>
    %53 = vector.shape_cast %52 : vector<1x1x4x8xf32> to vector<4x8xf32>
    %cst_52 = arith.constant dense<0.000000e+00> : vector<8x16x8xf32>
    %54 = tpu.matmul %51, %53, %cst_52 {dimension_numbers = #tpu.dot_dimension_numbers<[2], [0], [0, 1], [1], [0, 0, 0, 1, 1, 1], [], []>} : vector<8x16x4xf32>, vector<4x8xf32>, vector<8x16x8xf32> -> vector<8x16x8xf32>
    %55 = arith.addf %50, %54 : vector<8x16x8xf32>
    %c1_53 = arith.constant 1 : index
    %c1_54 = arith.constant 1 : index
    %c0_55 = arith.constant 0 : index
    %56 = vector.load %arg10[%c1_53, %c1_54, %c0_55] : memref<10x18x4xf32, #tpu.memory_space<vmem>>, vector<8x16x4xf32>
    %57 = vector.extract_strided_slice %34 {offsets = [1, 1, 0, 0], sizes = [1, 1, 4, 8], strides = [1, 1, 1, 1]} : vector<3x3x4x8xf32> to vector<1x1x4x8xf32>
    %58 = vector.shape_cast %57 : vector<1x1x4x8xf32> to vector<4x8xf32>
    %cst_56 = arith.constant dense<0.000000e+00> : vector<8x16x8xf32>
    %59 = tpu.matmul %56, %58, %cst_56 {dimension_numbers = #tpu.dot_dimension_numbers<[2], [0], [0, 1], [1], [0, 0, 0, 1, 1, 1], [], []>} : vector<8x16x4xf32>, vector<4x8xf32>, vector<8x16x8xf32> -> vector<8x16x8xf32>
    %60 = arith.addf %55, %59 : vector<8x16x8xf32>
    %c1_57 = arith.constant 1 : index
    %c2_58 = arith.constant 2 : index
    %c0_59 = arith.constant 0 : index
    %61 = vector.load %arg10[%c1_57, %c2_58, %c0_59] : memref<10x18x4xf32, #tpu.memory_space<vmem>>, vector<8x16x4xf32>
    %62 = vector.extract_strided_slice %34 {offsets = [1, 2, 0, 0], sizes = [1, 1, 4, 8], strides = [1, 1, 1, 1]} : vector<3x3x4x8xf32> to vector<1x1x4x8xf32>
    %63 = vector.shape_cast %62 : vector<1x1x4x8xf32> to vector<4x8xf32>
    %cst_60 = arith.constant dense<0.000000e+00> : vector<8x16x8xf32>
    %64 = tpu.matmul %61, %63, %cst_60 {dimension_numbers = #tpu.dot_dimension_numbers<[2], [0], [0, 1], [1], [0, 0, 0, 1, 1, 1], [], []>} : vector<8x16x4xf32>, vector<4x8xf32>, vector<8x16x8xf32> -> vector<8x16x8xf32>
    %65 = arith.addf %60, %64 : vector<8x16x8xf32>
    %c2_61 = arith.constant 2 : index
    %c0_62 = arith.constant 0 : index
    %c0_63 = arith.constant 0 : index
    %66 = vector.load %arg10[%c2_61, %c0_62, %c0_63] : memref<10x18x4xf32, #tpu.memory_space<vmem>>, vector<8x16x4xf32>
    %67 = vector.extract_strided_slice %34 {offsets = [2, 0, 0, 0], sizes = [1, 1, 4, 8], strides = [1, 1, 1, 1]} : vector<3x3x4x8xf32> to vector<1x1x4x8xf32>
    %68 = vector.shape_cast %67 : vector<1x1x4x8xf32> to vector<4x8xf32>
    %cst_64 = arith.constant dense<0.000000e+00> : vector<8x16x8xf32>
    %69 = tpu.matmul %66, %68, %cst_64 {dimension_numbers = #tpu.dot_dimension_numbers<[2], [0], [0, 1], [1], [0, 0, 0, 1, 1, 1], [], []>} : vector<8x16x4xf32>, vector<4x8xf32>, vector<8x16x8xf32> -> vector<8x16x8xf32>
    %70 = arith.addf %65, %69 : vector<8x16x8xf32>
    %c2_65 = arith.constant 2 : index
    %c1_66 = arith.constant 1 : index
    %c0_67 = arith.constant 0 : index
    %71 = vector.load %arg10[%c2_65, %c1_66, %c0_67] : memref<10x18x4xf32, #tpu.memory_space<vmem>>, vector<8x16x4xf32>
    %72 = vector.extract_strided_slice %34 {offsets = [2, 1, 0, 0], sizes = [1, 1, 4, 8], strides = [1, 1, 1, 1]} : vector<3x3x4x8xf32> to vector<1x1x4x8xf32>
    %73 = vector.shape_cast %72 : vector<1x1x4x8xf32> to vector<4x8xf32>
    %cst_68 = arith.constant dense<0.000000e+00> : vector<8x16x8xf32>
    %74 = tpu.matmul %71, %73, %cst_68 {dimension_numbers = #tpu.dot_dimension_numbers<[2], [0], [0, 1], [1], [0, 0, 0, 1, 1, 1], [], []>} : vector<8x16x4xf32>, vector<4x8xf32>, vector<8x16x8xf32> -> vector<8x16x8xf32>
    %75 = arith.addf %70, %74 : vector<8x16x8xf32>
    %c2_69 = arith.constant 2 : index
    %c2_70 = arith.constant 2 : index
    %c0_71 = arith.constant 0 : index
    %76 = vector.load %arg10[%c2_69, %c2_70, %c0_71] : memref<10x18x4xf32, #tpu.memory_space<vmem>>, vector<8x16x4xf32>
    %77 = vector.extract_strided_slice %34 {offsets = [2, 2, 0, 0], sizes = [1, 1, 4, 8], strides = [1, 1, 1, 1]} : vector<3x3x4x8xf32> to vector<1x1x4x8xf32>
    %78 = vector.shape_cast %77 : vector<1x1x4x8xf32> to vector<4x8xf32>
    %cst_72 = arith.constant dense<0.000000e+00> : vector<8x16x8xf32>
    %79 = tpu.matmul %76, %78, %cst_72 {dimension_numbers = #tpu.dot_dimension_numbers<[2], [0], [0, 1], [1], [0, 0, 0, 1, 1, 1], [], []>} : vector<8x16x4xf32>, vector<4x8xf32>, vector<8x16x8xf32> -> vector<8x16x8xf32>
    %80 = arith.addf %75, %79 : vector<8x16x8xf32>
    %81 = vector.shape_cast %4 : vector<8xf32> to vector<1x1x8xf32>
    %82 = vector.broadcast %81 : vector<1x1x8xf32> to vector<8x16x8xf32>
    %83 = arith.addf %80, %82 : vector<8x16x8xf32>
    %cst_73 = arith.constant 1.000000e-01 : f32
    %84 = vector.broadcast %cst_73 : f32 to vector<8x16x8xf32>
    %85 = arith.mulf %84, %83 : vector<8x16x8xf32>
    %86 = arith.maximumf %83, %85 : vector<8x16x8xf32>
    %87 = arith.addf %86, %6 : vector<8x16x8xf32>
    %c0_74 = arith.constant 0 : index
    %c0_75 = arith.constant 0 : index
    %c0_76 = arith.constant 0 : index
    %c0_77 = arith.constant 0 : index
    %88 = vector.load %arg9[%c0_74, %c0_75, %c0_76, %c0_77] : memref<1x8x16x8xf32, #tpu.memory_space<vmem>>, vector<1x8x16x8xf32>
    %89 = vector.shape_cast %88 : vector<1x8x16x8xf32> to vector<8x16x8xf32>
    %90 = vector.shape_cast %87 : vector<8x16x8xf32> to vector<1x8x16x8xf32>
    tpu.vector_store %arg9[%c0_74, %c0_75, %c0_76, %c0_77], %90 {strides = array<i32>} : memref<1x8x16x8xf32, #tpu.memory_space<vmem>>, vector<1x8x16x8xf32>,
    return
  }
  func.func @transform_0(%arg0: i32, %arg1: i32) -> (i32, i32, i32, i32) {
    %c0_i32 = arith.constant 0 : i32
    %c0_i32_0 = arith.constant 0 : i32
    %c0_i32_1 = arith.constant 0 : i32
    return %arg0, %arg1, %c0_i32, %c0_i32_0 : i32, i32, i32, i32
  }
  func.func @transform_1(%arg0: i32, %arg1: i32) -> (i32, i32, i32, i32) {
    %c0_i32 = arith.constant 0 : i32
    %c0_i32_0 = arith.constant 0 : i32
    %c0_i32_1 = arith.constant 0 : i32
    return %arg0, %arg1, %c0_i32, %c0_i32_0 : i32, i32, i32, i32
  }
  func.func @transform_2(%arg0: i32, %arg1: i32) -> (i32, i32, i32, i32) {
    %c0_i32 = arith.constant 0 : i32
    %c0_i32_0 = arith.constant 0 : i32
    %c0_i32_1 = arith.constant 0 : i32
    return %arg0, %arg1, %c0_i32, %c0_i32_0 : i32, i32, i32, i32
  }
  func.func @transform_3(%arg0: i32, %arg1: i32) -> (i32, i32) {
    %c0_i32 = arith.constant 0 : i32
    %c0_i32_0 = arith.constant 0 : i32
    %c0_i32_1 = arith.constant 0 : i32
    return %c0_i32, %c0_i32_0 : i32, i32
  }
  func.func @transform_4(%arg0: i32, %arg1: i32) -> (i32, i32) {
    %c0_i32 = arith.constant 0 : i32
    %c0_i32_0 = arith.constant 0 : i32
    %c0_i32_1 = arith.constant 0 : i32
    return %c0_i32, %c0_i32_0 : i32, i32
  }
  func.func @transform_5(%arg0: i32, %arg1: i32) -> (i32, i32, i32, i32) {
    %c0_i32 = arith.constant 0 : i32
    %c0_i32_0 = arith.constant 0 : i32
    %c0_i32_1 = arith.constant 0 : i32
    %c0_i32_2 = arith.constant 0 : i32
    %c0_i32_3 = arith.constant 0 : i32
    return %c0_i32, %c0_i32_0, %c0_i32_1, %c0_i32_2 : i32, i32, i32, i32
  }
  func.func @transform_6(%arg0: i32, %arg1: i32) -> (i32, i32) {
    %c0_i32 = arith.constant 0 : i32
    %c0_i32_0 = arith.constant 0 : i32
    %c0_i32_1 = arith.constant 0 : i32
    return %c0_i32, %c0_i32_0 : i32, i32
  }
  func.func @transform_7(%arg0: i32, %arg1: i32) -> (i32, i32, i32, i32) {
    %c0_i32 = arith.constant 0 : i32
    %c0_i32_0 = arith.constant 0 : i32
    %c0_i32_1 = arith.constant 0 : i32
    return %arg0, %arg1, %c0_i32, %c0_i32_0 : i32, i32, i32, i32
  }
}

</mosaic_0001>

<bundles_post_ra>
// kernel: residual_block_forward.2
= control target key start
LH: loop header
LB: loop body
LE: loop exit
PB: predicated region body
PF: predicated region fallthrough
CT: control target
= control target key end

     0   :  { %s3776_s24 = smov 0   ;;  %s3778_s25 = smov 0   ;;  %s4629_s0 = inlined_call_operand.vmem [shape: f32[2,16,16,8], index: 0, kind: input, shape index: {}]   ;;  %s4630_s1 = inlined_call_operand.vmem [shape: f32[2,2,16,8], index: 1, kind: input, shape index: {}]   ;;  %s4631_s2 = inlined_call_operand.vmem [shape: f32[2,2,16,8], index: 2, kind: input, shape index: {}]   ;;  %s4632_s3 = inlined_call_operand.vmem [shape: f32[8,4], index: 3, kind: input, shape index: {}]   ;;  %s4633_s4 = inlined_call_operand.vmem [shape: f32[1,4], index: 4, kind: input, shape index: {}]   ;;  %s4634_s5 = inlined_call_operand.vmem [shape: f32[3,3,4,8], index: 5, kind: input, shape index: {}]   ;;  %s4635_s6 = inlined_call_operand.vmem [shape: f32[1,8], index: 6, kind: input, shape index: {}]   ;;  %s4636_s7 = inlined_call_operand.vmem [shape: f32[2,16,16,8], index: 7, kind: output, shape index: {}]  }
   0x1   :  { %s3780_s26 = smov 0   ;;  %s3782_s27 = smov 0  }
   0x2   :  { %s3784_s28 = smov 0  }
   0x3 LB: > { %s26_s29 = sadd.s32 1, %s3725_s26  ;;  %s29_s30 = sadd.s32 1, %s3729_s27  ;;  %s3733_s28 = sphi %s3784_s28, %s17_s28   ;;  %s3729_s27 = sphi %s3782_s27, %s4700_s27   ;;  %s3725_s26 = sphi %s3780_s26, %s4699_s26   ;;  %s3721_s25 = sphi %s3778_s25, %s4698_s25   ;;  %s3717_s24 = sphi %s3776_s24, %s4697_s24  }
   0x4   : > { %p27_p0 = scmp.ge.s32.totalorder %s26_s29, 2  ;;  %p3004_p1 = scmp.ge.s32.totalorder %s3733_s28, 1 }
   0x5   : > { %p291_p2 = scmp.lt.s32.totalorder %s3733_s28, 5 }
   0x6   : > { %s4702_s29 = smov (%p27_p0, %s26_s29), 0  ;;  %s4704_s30 = smov (!%p27_p0, %s29_s30), %s3729_s27 }
   0x7   : > { %p292_p3 = pnand %p3004_p1, %p291_p2  ;;  %p31_p4 = scmp.ge.s32.totalorder %s4704_s30, 2 }
   0x9   : > { %s4706_s30 = smov (%p31_p4, %s4704_s30), 0  ;;  %295 = sbr.rel (%p292_p3) target bundleno = 604 (0x25c), region = 48 }
   0xe   : > { %v391_v0 = vld [vmem:[%s4632_s3] sm:$0xff]  ;;  %s3005_s10 = sshll.u32 %s3717_s24, 3  ;;  %p352_p5 = scmp.lt.s32.totalorder %s3721_s25, 1  ;;  %vm420_vm0 = vcmask 64512   ;;  %vm698_vm1 = vcmask 24576   ;;  %v3735_v21 = vmov 0.0  }
   0xf   : > { %3370 = vmatprep.subr.mxu0 %v391_v0  ;;  %p354_p6 = scmp.lt.s32.totalorder %s3005_s10, 15  ;;  %3636 = vmatprep.subr.mxu1 %v391_v0  ;;  %p364_p7 = scmp.lt.s32.totalorder %s3717_s24, 1  ;;  %709 = vst.msk [vmem:[#allocation2 + $0x11] sm:$0x1] %vm698_vm1, %v3735_v21  ;;  %699 = vst.msk [vmem:[#allocation2] sm:$0x1] %vm698_vm1, %v3735_v21 }
  0x10   : > { %3371 = vmatpush3.msra.mxu0 %v391_v0  ;;  %s4708_s25 = smov (!%p352_p5, %s3721_s25), 1  ;;  %3637 = vmatpush3.msra.mxu1 %v391_v0  ;;  %700 = vst.msk [vmem:[#allocation2 + $0x18] sm:$0x1] %vm698_vm1, %v3735_v21  ;;  %701 = vst.msk [vmem:[#allocation2 + $0x30] sm:$0x1] %vm698_vm1, %v3735_v21  ;;  %vm831_vm2 = vcmask 1043456  }
  0x11   : > { %s4710_s10 = smov (!%p354_p6, %s3005_s10), 15  ;;  %s3007_s11 = sshll.u32 %s4708_s25, 5  ;;  %702 = vst.msk [vmem:[#allocation2 + $0x48] sm:$0x1] %vm698_vm1, %v3735_v21  ;;  %703 = vst.msk [vmem:[#allocation2 + $0x60] sm:$0x1] %vm698_vm1, %v3735_v21 }
  0x12   : > { %s3006_s12 = sshll.u32 %s4710_s10, 1  ;;  %s3010_s15 = sshll.u32 %s4708_s25, 2  ;;  %704 = vst.msk [vmem:[#allocation2 + $0x78] sm:$0x1] %vm698_vm1, %v3735_v21  ;;  %705 = vst.msk [vmem:[#allocation2 + $0x90] sm:$0x1] %vm698_vm1, %v3735_v21 }
  0x13   : > { %s3813_s13 = sadd.s32 %s3007_s11, %s3006_s12  ;;  %706 = vst.msk [vmem:[#allocation2 + $0xa8] sm:$0x1] %vm698_vm1, %v3735_v21  ;;  %707 = vst.msk [vmem:[#allocation2 + $0xc0] sm:$0x1] %vm698_vm1, %v3735_v21  ;;  %v743_v22 = vld [vmem:[%s4634_s5 + $0x4] sm:$0xf] }
  0x14   : > { %s3008_s14 = sshll.u32 %s3813_s13, 3  ;;  %708 = vst.msk [vmem:[#allocation2 + $0xd8] sm:$0x1] %vm698_vm1, %v3735_v21  ;;  %710 = vst.msk [vmem:[#allocation2 + $0x29] sm:$0x1] %vm698_vm1, %v3735_v21  ;;  %3402 = vmatprep.subr.msk.mxu1 %vm831_vm2, %v743_v22  ;;  %p686_p8 = scmp.gt.s32.totalorder %s3717_s24, 0 }
  0x15   : > { %s365_s16 = scalar_select %p364_p7, %s3717_s24, 1  ;;  %711 = vst.msk [vmem:[#allocation2 + $0x41] sm:$0x1] %vm698_vm1, %v3735_v21  ;;  %712 = vst.msk [vmem:[#allocation2 + $0x59] sm:$0x1] %vm698_vm1, %v3735_v21  ;;  %vm719_vm4 = vcmask 31744  }
  0x16   : > { %s3824_s19 = scalar_lea.vmem %s4629_s0, %s3008_s14  ;;  %713 = vst.msk [vmem:[#allocation2 + $0x71] sm:$0x1] %vm698_vm1, %v3735_v21  ;;  %714 = vst.msk [vmem:[#allocation2 + $0x89] sm:$0x1] %vm698_vm1, %v3735_v21  ;;  %v744_v23 = vld [vmem:[%s4634_s5 + $0x8] sm:$0xf]  ;;  %s4519_s25 = scalar_lea.vmem %s4636_s7, %s3008_s14 }
  0x17   : > { %s3009_s20 = sshll.u32 %s365_s16, 1  ;;  %v394_v1 = vld [vmem:[%s3824_s19] sm:$0xff]  ;;  %v395_v6 = vld [vmem:[%s3824_s19 + $0x8] sm:$0xff]  ;;  %v396_v7 = vld [vmem:[%s3824_s19 + $0x10] sm:$0xff]  ;;  %715 = vst.msk [vmem:[#allocation2 + $0xa1] sm:$0x1] %vm698_vm1, %v3735_v21  ;;  %3454 = vmatprep.subr.msk.mxu0 %vm831_vm2, %v744_v23 }
  0x18   : > { %s368_s21 = sadd.s32 %s3010_s15, %s3009_s20  ;;  %v397_v8 = vld [vmem:[%s3824_s19 + $0x18] sm:$0xff]  ;;  %v398_v9 = vld [vmem:[%s3824_s19 + $0x20] sm:$0xff]  ;;  %v399_v10 = vld [vmem:[%s3824_s19 + $0x28] sm:$0xff]  ;;  %716 = vst.msk [vmem:[#allocation2 + $0xb9] sm:$0x1] %vm698_vm1, %v3735_v21 }
  0x19   : > { %s3011_s22 = sshll.u32 %s368_s21, 3  ;;  %v400_v11 = vld [vmem:[%s3824_s19 + $0x30] sm:$0xff]  ;;  %v401_v12 = vld [vmem:[%s3824_s19 + $0x38] sm:$0xff]  ;;  %v402_v13 = vld [vmem:[%s3824_s19 + $0x40] sm:$0xff]  ;;  %717 = vst.msk [vmem:[#allocation2 + $0xd1] sm:$0x1] %vm698_vm1, %v3735_v21 }
  0x1a   : > { %s370_s9 = scalar_lea.vmem %s4630_s1, %s3011_s22  ;;  %s379_s11 = scalar_lea.vmem %s4631_s2, %s3011_s22  ;;  %v403_v14 = vld [vmem:[%s3824_s19 + $0x48] sm:$0xff]  ;;  %v404_v15 = vld [vmem:[%s3824_s19 + $0x50] sm:$0xff]  ;;  %v405_v16 = vld [vmem:[%s3824_s19 + $0x58] sm:$0xff]  ;;  %718 = vst.msk [vmem:[#allocation2 + $0xe9] sm:$0x1] %vm698_vm1, %v3735_v21 }
  0x1b   : > { %v410_v2 = vld [vmem:[%s370_s9] sm:$0xff]  ;;  %v411_v3 = vld [vmem:[%s370_s9 + $0x8] sm:$0xff]  ;;  %v408_v19 = vld [vmem:[%s3824_s19 + $0x70] sm:$0xff]  ;;  %s687_s23 = scalar_select %p686_p8, 1, 0 }
  0x1c   : > { %v412_v4 = vld [vmem:[%s379_s11] sm:$0xff]  ;;  %3372 = vmatprep.mubr.msk.f32.mxu0 %vm420_vm0, %v410_v2  ;;  %v413_v5 = vld [vmem:[%s379_s11 + $0x8] sm:$0xff]  ;;  %v409_v20 = vld [vmem:[%s3824_s19 + $0x78] sm:$0xff]  ;;  %s693_s8 = scalar_select %p364_p7, 1, 0 }
  0x1d   : > { %3399 = vmatprep.mubr.msk.f32.mxu1 %vm420_vm0, %v412_v4  ;;  %3373 = vmatmul.mubr.msk.f32.vlgmr.msra.gmra.mxu0 %vm420_vm0, %v411_v3  ;;  %v406_v17 = vld [vmem:[%s3824_s19 + $0x60] sm:$0xff]  ;;  %v407_v18 = vld [vmem:[%s3824_s19 + $0x68] sm:$0xff]  ;;  %v3908_v25 = vld [vmem:[%s4634_s5 + $0x10] sm:$0xf]  ;;  %v688_v30 = vstv %s687_s23 }
  0x1e   : > { %3400 = vmatmul.mubr.msk.f32.vlgmr.msra.gmra.mxu1 %vm420_vm0, %v413_v5  ;;  %3375 = vmatprep.mubr.msk.f32.mxu0 %vm420_vm0, %v394_v1  ;;  %v3901_v24 = vld [vmem:[%s4634_s5] sm:$0xf]  ;;  %v694_v32 = vstv %s693_s8  ;;  %vm3924_vm3 = vcmp.eq.s32.totalorder %v688_v30, 1  ;;  %v3969_v21 = vld [vmem:[%s4634_s5 + $0x18] sm:$0xf] }
  0x1f   : > { %3403 = vmatpush3.msk.msra.mxu1 %vm831_vm2, %v743_v22  ;;  %3455 = vmatpush3.msk.msra.mxu0 %vm831_vm2, %v744_v23  ;;  %v3918_v26 = vld [vmem:[%s4633_s4] ss:$0 sm:$0xff]  ;;  %vm3928_vm5 = vcmp.eq.s32.totalorder %v694_v32, 1 }
  0x20   : > { %3428 = vmatprep.subr.msk.mxu1 %vm831_vm2, %v3901_v24  ;;  %3506 = vmatprep.subr.msk.mxu0 %vm831_vm2, %v3908_v25 }
  0x21   : > { %3376 = vmatmul.mubr.msk.f32.gmra.mxu0 %vm420_vm0, %v395_v6 }
  0x22   : > { %3378 = vmatprep.mubr.msk.f32.mxu0 %vm420_vm0, %v396_v7 }
  0x25   : > { %3379 = vmatmul.mubr.msk.f32.gmra.mxu0 %vm420_vm0, %v397_v8 }
  0x26   : > { %3381 = vmatprep.mubr.msk.f32.mxu0 %vm420_vm0, %v398_v9 }
  0x29   : > { %3382 = vmatmul.mubr.msk.f32.gmra.mxu0 %vm420_vm0, %v399_v10 }
  0x2a   : > { %3384 = vmatprep.mubr.msk.f32.mxu0 %vm420_vm0, %v400_v11 }
  0x2d   : > { %3385 = vmatmul.mubr.msk.f32.gmra.mxu0 %vm420_vm0, %v401_v12 }
  0x2e   : > { %3387 = vmatprep.mubr.msk.f32.mxu0 %vm420_vm0, %v402_v13 }
  0x31   : > { %3388 = vmatmul.mubr.msk.f32.gmra.mxu0 %vm420_vm0, %v403_v14 }
  0x32   : > { %3390 = vmatprep.mubr.msk.f32.mxu0 %vm420_vm0, %v404_v15 }
  0x35   : > { %3391 = vmatmul.mubr.msk.f32.gmra.mxu0 %vm420_vm0, %v405_v16 }
  0x36   : > { %3393 = vmatprep.mubr.msk.f32.mxu0 %vm420_vm0, %v406_v17 }
  0x39   : > { %3394 = vmatmul.mubr.msk.f32.gmra.mxu0 %vm420_vm0, %v407_v18 }
  0x3a   : > { %3396 = vmatprep.mubr.msk.f32.mxu0 %vm420_vm0, %v408_v19 }
  0x3d   : > { %3397 = vmatmul.mubr.msk.f32.gmra.mxu0 %vm420_vm0, %v409_v20  ;;  %v3964_v20 = vld [vmem:[%s4634_s5 + $0xc] sm:$0xf] }
  0xdd   : > { %v3374_v27 = vpop.f32.mrf.mxu0 }
  0xde   : > { %v3401_v28 = vpop.f32.mrf.mxu1  ;;  %v553_v29 = vadd.f32 %v3374_v27, %v3918_v26 }
  0xdf   : > { %v643_v31 = vadd.f32 %v3401_v28, %v3918_v26  ;;  %v547_v33 = vpop.f32.mrf.mxu0 }
  0xe0   : > { %v637_v34 = vpop.f32.mrf.mxu1  ;;  %v647_v35 = vmul.f32 0.1, %v553_v29  ;;  %v548_v36 = vadd.f32 %v3918_v26, %v547_v33 }
  0xe1   : > { %v665_v37 = vmul.f32 0.1, %v643_v31  ;;  %v638_v38 = vadd.f32 %v3918_v26, %v637_v34  ;;  %v3377_v40 = vpop.f32.mrf.mxu0 }
  0xe2   : > { %v667_v42 = vmax.f32 %v553_v29, %v647_v35  ;;  %v646_v43 = vmul.f32 0.1, %v548_v36  ;;  %v563_v44 = vadd.f32 %v3377_v40, %v3918_v26 }
  0xe3   : > { %v685_v45 = vmax.f32 %v643_v31, %v665_v37  ;;  %v557_v46 = vpop.f32.mrf.mxu0  ;;  %v664_v47 = vmul.f32 0.1, %v638_v38 }
  0xe4   : > { %v691_v48 = vsel %vm3924_vm3, %v667_v42, 0.0  ;;  %v666_v49 = vmax.f32 %v548_v36, %v646_v43  ;;  %v649_v50 = vmul.f32 0.1, %v563_v44  ;;  %v558_v51 = vadd.f32 %v3918_v26, %v557_v46 }
  0xe5   : > { %721 = vst.msk [vmem:[#allocation2 + $0x9] sm:$0xff] %vm719_vm4, %v691_v48  ;;  %v3380_v52 = vpop.f32.mrf.mxu0  ;;  %v697_v53 = vsel %vm3928_vm5, %v685_v45, 0.0  ;;  %v684_v54 = vmax.f32 %v638_v38, %v664_v47 }
  0xe6   : > { %v690_v55 = vsel %vm3924_vm3, %v666_v49, 0.0  ;;  %v669_v56 = vmax.f32 %v563_v44, %v649_v50  ;;  %v648_v57 = vmul.f32 0.1, %v558_v51  ;;  %v573_v58 = vadd.f32 %v3380_v52, %v3918_v26  ;;  %741 = vst.msk [vmem:[#allocation2 + $0xe1] sm:$0xff] %vm719_vm4, %v697_v53 }
  0xe7   : > { %720 = vst.msk [vmem:[#allocation2 + $0x1] sm:$0xff] %vm719_vm4, %v690_v55  ;;  %v567_v59 = vpop.f32.mrf.mxu0  ;;  %v696_v60 = vsel %vm3928_vm5, %v684_v54, 0.0 }
  0xe8   : > { %724 = vst.msk [vmem:[#allocation2 + $0x21] sm:$0xff] %vm719_vm4, %v669_v56  ;;  %v668_v61 = vmax.f32 %v558_v51, %v648_v57  ;;  %v651_v62 = vmul.f32 0.1, %v573_v58  ;;  %v568_v63 = vadd.f32 %v3918_v26, %v567_v59  ;;  %740 = vst.msk [vmem:[#allocation2 + $0xd9] sm:$0xff] %vm719_vm4, %v696_v60 }
  0xe9   : > { %v3383_v0 = vpop.f32.mrf.mxu0 }
  0xea   : > { %723 = vst.msk [vmem:[#allocation2 + $0x19] sm:$0xff] %vm719_vm4, %v668_v61  ;;  %v671_v1 = vmax.f32 %v573_v58, %v651_v62  ;;  %v650_v2 = vmul.f32 0.1, %v568_v63  ;;  %v583_v3 = vadd.f32 %v3383_v0, %v3918_v26 }
  0xeb   : > { %v577_v4 = vpop.f32.mrf.mxu0 }
  0xec   : > { %726 = vst.msk [vmem:[#allocation2 + $0x39] sm:$0xff] %vm719_vm4, %v671_v1  ;;  %v670_v5 = vmax.f32 %v568_v63, %v650_v2  ;;  %v653_v6 = vmul.f32 0.1, %v583_v3  ;;  %v578_v7 = vadd.f32 %v3918_v26, %v577_v4  ;;  %v768_v15 = vld [vmem:[#allocation2 + $0x9] sm:$0xff] }
  0xed   : > { %v3386_v8 = vpop.f32.mrf.mxu0  ;;  %v1177_v16 = vld [vmem:[#allocation2 + $0xa] sm:$0xff] }
  0xee   : > { %725 = vst.msk [vmem:[#allocation2 + $0x31] sm:$0xff] %vm719_vm4, %v670_v5  ;;  %v673_v9 = vmax.f32 %v583_v3, %v653_v6  ;;  %v652_v10 = vmul.f32 0.1, %v578_v7  ;;  %v593_v11 = vadd.f32 %v3386_v8, %v3918_v26  ;;  %v767_v12 = vld [vmem:[#allocation2 + $0x1] sm:$0xff] }
  0xef   : > { %v1176_v13 = vld [vmem:[#allocation2 + $0x2] sm:$0xff]  ;;  %v587_v14 = vpop.f32.mrf.mxu0  ;;  %3404 = vmatprep.mubr.msk.f32.mxu1 %vm719_vm4, %v767_v12 }
  0xf0   : > { %3456 = vmatprep.mubr.msk.f32.mxu0 %vm719_vm4, %v1176_v13  ;;  %728 = vst.msk [vmem:[#allocation2 + $0x51] sm:$0xff] %vm719_vm4, %v673_v9  ;;  %v672_v17 = vmax.f32 %v578_v7, %v652_v10  ;;  %v655_v18 = vmul.f32 0.1, %v593_v11  ;;  %v588_v19 = vadd.f32 %v3918_v26, %v587_v14  ;;  %3405 = vmatmul.mubr.msk.f32.vlgmr.msra.gmra.mxu1 %vm719_vm4, %v768_v15  ;;  %v3985_v31 = vld [vmem:[#allocation2 + $0x21] sm:$0xff] }
  0xf1   : > { %3457 = vmatmul.mubr.msk.f32.vlgmr.msra.gmra.mxu0 %vm719_vm4, %v1177_v16  ;;  %3429 = vmatpush3.msk.msra.mxu1 %vm831_vm2, %v3901_v24  ;;  %v3389_v22 = vpop.f32.mrf.mxu0  ;;  %v3973_v23 = vld [vmem:[#allocation2 + $0x19] sm:$0xff]  ;;  %v3987_v32 = vld [vmem:[#allocation2 + $0x22] sm:$0xff] }
  0xf2   : > { %v3975_v27 = vld [vmem:[#allocation2 + $0x1a] sm:$0xff]  ;;  %3507 = vmatpush3.msk.msra.mxu0 %vm831_vm2, %v3908_v25  ;;  %727 = vst.msk [vmem:[#allocation2 + $0x49] sm:$0xff] %vm719_vm4, %v672_v17  ;;  %v675_v28 = vmax.f32 %v593_v11, %v655_v18  ;;  %v654_v29 = vmul.f32 0.1, %v588_v19  ;;  %v603_v30 = vadd.f32 %v3389_v22, %v3918_v26  ;;  %3407 = vmatprep.mubr.msk.f32.mxu1 %vm719_vm4, %v3973_v23 }
  0xf3   : > { %3459 = vmatprep.mubr.msk.f32.mxu0 %vm719_vm4, %v3975_v27  ;;  %v597_v24 = vpop.f32.mrf.mxu0  ;;  %3480 = vmatprep.subr.msk.mxu1 %vm831_vm2, %v3964_v20  ;;  %v4009_v42 = vld [vmem:[#allocation2 + $0x39] sm:$0xff] }
  0xf4   : > { %3558 = vmatprep.subr.msk.mxu0 %vm831_vm2, %v3969_v21  ;;  %730 = vst.msk [vmem:[#allocation2 + $0x69] sm:$0xff] %vm719_vm4, %v675_v28  ;;  %v674_v25 = vmax.f32 %v588_v19, %v654_v29  ;;  %v657_v33 = vmul.f32 0.1, %v603_v30  ;;  %v598_v34 = vadd.f32 %v3918_v26, %v597_v24  ;;  %3408 = vmatmul.mubr.msk.f32.gmra.mxu1 %vm719_vm4, %v3985_v31  ;;  %v4011_v43 = vld [vmem:[#allocation2 + $0x3a] sm:$0xff]  ;;  %v752_v29 = vld [vmem:[#allocation2 + $0x8] sm:$0xff] }
  0xf5   : > { %3460 = vmatmul.mubr.msk.f32.gmra.mxu0 %vm719_vm4, %v3987_v32  ;;  %v3392_v35 = vpop.f32.mrf.mxu0  ;;  %v3999_v36 = vld [vmem:[#allocation2 + $0x31] sm:$0xff]  ;;  %v751_v28 = vld [vmem:[#allocation2] sm:$0xff] }
  0xf6   : > { %v4001_v37 = vld [vmem:[#allocation2 + $0x32] sm:$0xff]  ;;  %729 = vst.msk [vmem:[#allocation2 + $0x61] sm:$0xff] %vm719_vm4, %v674_v25  ;;  %v677_v38 = vmax.f32 %v603_v30, %v657_v33  ;;  %v656_v39 = vmul.f32 0.1, %v598_v34  ;;  %v613_v40 = vadd.f32 %v3392_v35, %v3918_v26  ;;  %3410 = vmatprep.mubr.msk.f32.mxu1 %vm719_vm4, %v3999_v36  ;;  %v750_v25 = vld [vmem:[%s4634_s5 + $0x20] sm:$0xf] }
  0xf7   : > { %3462 = vmatprep.mubr.msk.f32.mxu0 %vm719_vm4, %v4001_v37  ;;  %v607_v41 = vpop.f32.mrf.mxu0  ;;  %v4029_v54 = vld [vmem:[#allocation2 + $0x51] sm:$0xff] }
  0xf8   : > { %732 = vst.msk [vmem:[#allocation2 + $0x81] sm:$0xff] %vm719_vm4, %v677_v38  ;;  %v676_v44 = vmax.f32 %v598_v34, %v656_v39  ;;  %v659_v45 = vmul.f32 0.1, %v613_v40  ;;  %v608_v46 = vadd.f32 %v3918_v26, %v607_v41  ;;  %3411 = vmatmul.mubr.msk.f32.gmra.mxu1 %vm719_vm4, %v4009_v42  ;;  %v4031_v55 = vld [vmem:[#allocation2 + $0x52] sm:$0xff] }
  0xf9   : > { %3463 = vmatmul.mubr.msk.f32.gmra.mxu0 %vm719_vm4, %v4011_v43  ;;  %v3395_v47 = vpop.f32.mrf.mxu0  ;;  %v4019_v48 = vld [vmem:[#allocation2 + $0x49] sm:$0xff]  ;;  %v747_v30 = vld [vmem:[%s4634_s5 + $0x14] sm:$0xf]  ;;  %v753_v24 = vld [vmem:[#allocation2 + $0x18] sm:$0xff] }
  0xfa   : > { %v4021_v49 = vld [vmem:[#allocation2 + $0x4a] sm:$0xff]  ;;  %731 = vst.msk [vmem:[#allocation2 + $0x79] sm:$0xff] %vm719_vm4, %v676_v44  ;;  %v679_v50 = vmax.f32 %v613_v40, %v659_v45  ;;  %v658_v51 = vmul.f32 0.1, %v608_v46  ;;  %v623_v52 = vadd.f32 %v3395_v47, %v3918_v26  ;;  %3413 = vmatprep.mubr.msk.f32.mxu1 %vm719_vm4, %v4019_v48 }
  0xfb   : > { %3465 = vmatprep.mubr.msk.f32.mxu0 %vm719_vm4, %v4021_v49  ;;  %v617_v53 = vpop.f32.mrf.mxu0  ;;  %v4049_v1 = vld [vmem:[#allocation2 + $0x69] sm:$0xff] }
  0xfc   : > { %734 = vst.msk [vmem:[#allocation2 + $0x99] sm:$0xff] %vm719_vm4, %v679_v50  ;;  %v678_v56 = vmax.f32 %v608_v46, %v658_v51  ;;  %v661_v57 = vmul.f32 0.1, %v623_v52  ;;  %v618_v58 = vadd.f32 %v3918_v26, %v617_v53  ;;  %3414 = vmatmul.mubr.msk.f32.gmra.mxu1 %vm719_vm4, %v4029_v54  ;;  %v4051_v2 = vld [vmem:[#allocation2 + $0x6a] sm:$0xff]  ;;  %v749_v50 = vld [vmem:[%s4634_s5 + $0x1c] sm:$0xf] }
  0xfd   : > { %3466 = vmatmul.mubr.msk.f32.gmra.mxu0 %vm719_vm4, %v4031_v55  ;;  %v4039_v59 = vld [vmem:[#allocation2 + $0x61] sm:$0xff]  ;;  %v3398_v61 = vpop.f32.mrf.mxu0  ;;  %v758_v33 = vld [vmem:[#allocation2 + $0x50] sm:$0xff]  ;;  %v2103_v53 = vld [vmem:[#allocation2 + $0xd8] sm:$0xff] }
  0xfe   : > { %v4041_v60 = vld [vmem:[#allocation2 + $0x62] sm:$0xff]  ;;  %733 = vst.msk [vmem:[#allocation2 + $0x91] sm:$0xff] %vm719_vm4, %v678_v56  ;;  %v681_v62 = vmax.f32 %v623_v52, %v661_v57  ;;  %v660_v63 = vmul.f32 0.1, %v618_v58  ;;  %3416 = vmatprep.mubr.msk.f32.mxu1 %vm719_vm4, %v4039_v59  ;;  %v633_v0 = vadd.f32 %v3398_v61, %v3918_v26 }
  0xff   : > { %3468 = vmatprep.mubr.msk.f32.mxu0 %vm719_vm4, %v4041_v60  ;;  %v627_v3 = vpop.f32.mrf.mxu0  ;;  %v4068_v11 = vld [vmem:[#allocation2 + $0x81] sm:$0xff] }
 0x100   : > { %736 = vst.msk [vmem:[#allocation2 + $0xb1] sm:$0xff] %vm719_vm4, %v681_v62  ;;  %v680_v4 = vmax.f32 %v618_v58, %v660_v63  ;;  %3417 = vmatmul.mubr.msk.f32.gmra.mxu1 %vm719_vm4, %v4049_v1  ;;  %v663_v5 = vmul.f32 0.1, %v633_v0  ;;  %v628_v6 = vadd.f32 %v3918_v26, %v627_v3  ;;  %v4070_v12 = vld [vmem:[#allocation2 + $0x82] sm:$0xff] }
 0x101   : > { %3469 = vmatmul.mubr.msk.f32.gmra.mxu0 %vm719_vm4, %v4051_v2  ;;  %v4059_v7 = vld [vmem:[#allocation2 + $0x79] sm:$0xff]  ;;  %v760_v35 = vld [vmem:[#allocation2 + $0x68] sm:$0xff] }
 0x102   : > { %v4061_v8 = vld [vmem:[#allocation2 + $0x7a] sm:$0xff]  ;;  %735 = vst.msk [vmem:[#allocation2 + $0xa9] sm:$0xff] %vm719_vm4, %v680_v4  ;;  %3419 = vmatprep.mubr.msk.f32.mxu1 %vm719_vm4, %v4059_v7  ;;  %v683_v9 = vmax.f32 %v633_v0, %v663_v5  ;;  %v662_v10 = vmul.f32 0.1, %v628_v6 }
 0x103   : > { %3471 = vmatprep.mubr.msk.f32.mxu0 %vm719_vm4, %v4061_v8  ;;  %v4086_v15 = vld [vmem:[#allocation2 + $0x99] sm:$0xff] }
 0x104   : > { %3420 = vmatmul.mubr.msk.f32.gmra.mxu1 %vm719_vm4, %v4068_v11  ;;  %738 = vst.msk [vmem:[#allocation2 + $0xc9] sm:$0xff] %vm719_vm4, %v683_v9  ;;  %v682_v26 = vmax.f32 %v628_v6, %v662_v10  ;;  %v4088_v16 = vld [vmem:[#allocation2 + $0x9a] sm:$0xff] }
 0x105   : > { %3472 = vmatmul.mubr.msk.f32.gmra.mxu0 %vm719_vm4, %v4070_v12  ;;  %v4077_v13 = vld [vmem:[#allocation2 + $0x91] sm:$0xff]  ;;  %v759_v34 = vld [vmem:[#allocation2 + $0x60] sm:$0xff] }
 0x106   : > { %v4079_v14 = vld [vmem:[#allocation2 + $0x92] sm:$0xff]  ;;  %3422 = vmatprep.mubr.msk.f32.mxu1 %vm719_vm4, %v4077_v13  ;;  %737 = vst.msk [vmem:[#allocation2 + $0xc1] sm:$0xff] %vm719_vm4, %v682_v26  ;;  %v762_v39 = vld [vmem:[#allocation2 + $0x80] sm:$0xff] }
 0x107   : > { %3474 = vmatprep.mubr.msk.f32.mxu0 %vm719_vm4, %v4079_v14  ;;  %v4102_v19 = vld [vmem:[#allocation2 + $0xb1] sm:$0xff]  ;;  %v2104_v56 = vld [vmem:[#allocation2 + $0xe0] sm:$0xff] }
 0x108   : > { %3423 = vmatmul.mubr.msk.f32.gmra.mxu1 %vm719_vm4, %v4086_v15  ;;  %v4104_v22 = vld [vmem:[#allocation2 + $0xb2] sm:$0xff] }
 0x109   : > { %3475 = vmatmul.mubr.msk.f32.gmra.mxu0 %vm719_vm4, %v4088_v16  ;;  %v4094_v17 = vld [vmem:[#allocation2 + $0xa9] sm:$0xff]  ;;  %v761_v38 = vld [vmem:[#allocation2 + $0x78] sm:$0xff] }
 0x10a   : > { %v4096_v18 = vld [vmem:[#allocation2 + $0xaa] sm:$0xff]  ;;  %3425 = vmatprep.mubr.msk.f32.mxu1 %vm719_vm4, %v4094_v17  ;;  %v764_v44 = vld [vmem:[#allocation2 + $0x98] sm:$0xff] }
 0x10b   : > { %3477 = vmatprep.mubr.msk.f32.mxu0 %vm719_vm4, %v4096_v18  ;;  %v763_v40 = vld [vmem:[#allocation2 + $0x90] sm:$0xff]  ;;  %v765_v45 = vld [vmem:[#allocation2 + $0xa8] sm:$0xff] }
 0x10c   : > { %3426 = vmatmul.mubr.msk.f32.gmra.mxu1 %vm719_vm4, %v4102_v19  ;;  %v4169_v46 = vld [vmem:[#allocation2 + $0xc9] sm:$0xff] }
 0x10d   : > { %3478 = vmatmul.mubr.msk.f32.gmra.mxu0 %vm719_vm4, %v4104_v22  ;;  %3430 = vmatprep.mubr.msk.f32.mxu1 %vm719_vm4, %v751_v28  ;;  %v4161_v41 = vld [vmem:[#allocation2 + $0xc1] sm:$0xff]  ;;  %v766_v47 = vld [vmem:[#allocation2 + $0xb0] sm:$0xff] }
 0x10e   : > { %3508 = vmatprep.mubr.msk.f32.mxu0 %vm719_vm4, %v3973_v23  ;;  %v754_v23 = vld [vmem:[#allocation2 + $0x20] sm:$0xff]  ;;  %v2102_v52 = vld [vmem:[#allocation2 + $0xc8] sm:$0xff] }
 0x10f   : > { %v2101_v51 = vld [vmem:[#allocation2 + $0xc0] sm:$0xff] }
 0x110   : > { %3431 = vmatmul.mubr.msk.f32.vlgmr.msra.gmra.mxu1 %vm719_vm4, %v752_v29 }
 0x111   : > { %3509 = vmatmul.mubr.msk.f32.vlgmr.msra.gmra.mxu0 %vm719_vm4, %v3985_v31  ;;  %3481 = vmatpush3.msk.msra.mxu1 %vm831_vm2, %v3964_v20  ;;  %v755_v20 = vld [vmem:[#allocation2 + $0x30] sm:$0xff]  ;;  %v756_v31 = vld [vmem:[#allocation2 + $0x38] sm:$0xff] }
 0x112   : > { %3433 = vmatprep.mubr.msk.f32.mxu1 %vm719_vm4, %v753_v24  ;;  %3511 = vmatprep.mubr.msk.f32.mxu0 %vm719_vm4, %v3999_v36 }
 0x113   : > { %3532 = vmatprep.subr.msk.mxu1 %vm831_vm2, %v747_v30  ;;  %3559 = vmatpush3.msk.msra.mxu0 %vm831_vm2, %v3969_v21  ;;  %v757_v21 = vld [vmem:[#allocation2 + $0x48] sm:$0xff] }
 0x114   : > { %3434 = vmatmul.mubr.msk.f32.gmra.mxu1 %vm719_vm4, %v754_v23  ;;  %3610 = vmatprep.subr.msk.mxu0 %vm831_vm2, %v750_v25 }
 0x115   : > { %3512 = vmatmul.mubr.msk.f32.gmra.mxu0 %vm719_vm4, %v4009_v42  ;;  %3436 = vmatprep.mubr.msk.f32.mxu1 %vm719_vm4, %v755_v20 }
 0x116   : > { %3514 = vmatprep.mubr.msk.f32.mxu0 %vm719_vm4, %v4019_v48 }
 0x118   : > { %3437 = vmatmul.mubr.msk.f32.gmra.mxu1 %vm719_vm4, %v756_v31 }
 0x119   : > { %3515 = vmatmul.mubr.msk.f32.gmra.mxu0 %vm719_vm4, %v4029_v54  ;;  %3439 = vmatprep.mubr.msk.f32.mxu1 %vm719_vm4, %v757_v21 }
 0x11a   : > { %3517 = vmatprep.mubr.msk.f32.mxu0 %vm719_vm4, %v4039_v59 }
 0x11c   : > { %3440 = vmatmul.mubr.msk.f32.gmra.mxu1 %vm719_vm4, %v758_v33 }
 0x11d   : > { %3518 = vmatmul.mubr.msk.f32.gmra.mxu0 %vm719_vm4, %v4049_v1  ;;  %3442 = vmatprep.mubr.msk.f32.mxu1 %vm719_vm4, %v759_v34 }
 0x11e   : > { %3520 = vmatprep.mubr.msk.f32.mxu0 %vm719_vm4, %v4059_v7 }
 0x120   : > { %3443 = vmatmul.mubr.msk.f32.gmra.mxu1 %vm719_vm4, %v760_v35 }
 0x121   : > { %3521 = vmatmul.mubr.msk.f32.gmra.mxu0 %vm719_vm4, %v4068_v11  ;;  %3445 = vmatprep.mubr.msk.f32.mxu1 %vm719_vm4, %v761_v38 }
 0x122   : > { %3523 = vmatprep.mubr.msk.f32.mxu0 %vm719_vm4, %v4077_v13 }
 0x124   : > { %3446 = vmatmul.mubr.msk.f32.gmra.mxu1 %vm719_vm4, %v762_v39 }
 0x125   : > { %3524 = vmatmul.mubr.msk.f32.gmra.mxu0 %vm719_vm4, %v4086_v15  ;;  %3448 = vmatprep.mubr.msk.f32.mxu1 %vm719_vm4, %v763_v40 }
 0x126   : > { %3526 = vmatprep.mubr.msk.f32.mxu0 %vm719_vm4, %v4094_v17 }
 0x128   : > { %3449 = vmatmul.mubr.msk.f32.gmra.mxu1 %vm719_vm4, %v764_v44 }
 0x129   : > { %3527 = vmatmul.mubr.msk.f32.gmra.mxu0 %vm719_vm4, %v4102_v19  ;;  %3451 = vmatprep.mubr.msk.f32.mxu1 %vm719_vm4, %v765_v45 }
 0x12a   : > { %3529 = vmatprep.mubr.msk.f32.mxu0 %vm719_vm4, %v4161_v41 }
 0x12c   : > { %3452 = vmatmul.mubr.msk.f32.gmra.mxu1 %vm719_vm4, %v766_v47 }
 0x12d   : > { %3530 = vmatmul.mubr.msk.f32.gmra.mxu0 %vm719_vm4, %v4169_v46  ;;  %3482 = vmatprep.mubr.msk.f32.mxu1 %vm719_vm4, %v753_v24 }
 0x12e   : > { %3560 = vmatprep.mubr.msk.f32.mxu0 %vm719_vm4, %v755_v20 }
 0x130   : > { %3483 = vmatmul.mubr.msk.f32.vlgmr.msra.gmra.mxu1 %vm719_vm4, %v754_v23 }
 0x131   : > { %3561 = vmatmul.mubr.msk.f32.vlgmr.msra.gmra.mxu0 %vm719_vm4, %v756_v31  ;;  %3533 = vmatpush3.msk.msra.mxu1 %vm831_vm2, %v747_v30 }
 0x132   : > { %3485 = vmatprep.mubr.msk.f32.mxu1 %vm719_vm4, %v755_v20  ;;  %3563 = vmatprep.mubr.msk.f32.mxu0 %vm719_vm4, %v757_v21 }
 0x133   : > { %3584 = vmatprep.subr.msk.mxu1 %vm831_vm2, %v749_v50  ;;  %3611 = vmatpush3.msk.msra.mxu0 %vm831_vm2, %v750_v25 }
 0x134   : > { %3486 = vmatmul.mubr.msk.f32.gmra.mxu1 %vm719_vm4, %v756_v31 }
 0x135   : > { %3564 = vmatmul.mubr.msk.f32.gmra.mxu0 %vm719_vm4, %v758_v33  ;;  %3488 = vmatprep.mubr.msk.f32.mxu1 %vm719_vm4, %v757_v21 }
 0x136   : > { %3566 = vmatprep.mubr.msk.f32.mxu0 %vm719_vm4, %v759_v34 }
 0x138   : > { %3489 = vmatmul.mubr.msk.f32.gmra.mxu1 %vm719_vm4, %v758_v33 }
 0x139   : > { %3567 = vmatmul.mubr.msk.f32.gmra.mxu0 %vm719_vm4, %v760_v35  ;;  %3491 = vmatprep.mubr.msk.f32.mxu1 %vm719_vm4, %v759_v34 }
 0x13a   : > { %3569 = vmatprep.mubr.msk.f32.mxu0 %vm719_vm4, %v761_v38 }
 0x13c   : > { %3492 = vmatmul.mubr.msk.f32.gmra.mxu1 %vm719_vm4, %v760_v35 }
 0x13d   : > { %3570 = vmatmul.mubr.msk.f32.gmra.mxu0 %vm719_vm4, %v762_v39  ;;  %3494 = vmatprep.mubr.msk.f32.mxu1 %vm719_vm4, %v761_v38 }
 0x13e   : > { %3572 = vmatprep.mubr.msk.f32.mxu0 %vm719_vm4, %v763_v40 }
 0x140   : > { %3495 = vmatmul.mubr.msk.f32.gmra.mxu1 %vm719_vm4, %v762_v39 }
 0x141   : > { %3573 = vmatmul.mubr.msk.f32.gmra.mxu0 %vm719_vm4, %v764_v44  ;;  %3497 = vmatprep.mubr.msk.f32.mxu1 %vm719_vm4, %v763_v40 }
 0x142   : > { %3575 = vmatprep.mubr.msk.f32.mxu0 %vm719_vm4, %v765_v45 }
 0x144   : > { %3498 = vmatmul.mubr.msk.f32.gmra.mxu1 %vm719_vm4, %v764_v44 }
 0x145   : > { %3576 = vmatmul.mubr.msk.f32.gmra.mxu0 %vm719_vm4, %v766_v47  ;;  %3500 = vmatprep.mubr.msk.f32.mxu1 %vm719_vm4, %v765_v45 }
 0x146   : > { %3578 = vmatprep.mubr.msk.f32.mxu0 %vm719_vm4, %v2101_v51 }
 0x148   : > { %3501 = vmatmul.mubr.msk.f32.gmra.mxu1 %vm719_vm4, %v766_v47 }
 0x149   : > { %3579 = vmatmul.mubr.msk.f32.gmra.mxu0 %vm719_vm4, %v2102_v52  ;;  %3503 = vmatprep.mubr.msk.f32.mxu1 %vm719_vm4, %v2101_v51 }
 0x14a   : > { %3581 = vmatprep.mubr.msk.f32.mxu0 %vm719_vm4, %v2103_v53 }
 0x14c   : > { %3504 = vmatmul.mubr.msk.f32.gmra.mxu1 %vm719_vm4, %v2102_v52 }
 0x14d   : > { %3582 = vmatmul.mubr.msk.f32.gmra.mxu0 %vm719_vm4, %v2104_v56  ;;  %3534 = vmatprep.mubr.msk.f32.mxu1 %vm719_vm4, %v3975_v27  ;;  %v2557_v27 = vld [vmem:[#allocation2 + $0xc2] sm:$0xff] }
 0x14e   : > { %3612 = vmatprep.mubr.msk.f32.mxu0 %vm719_vm4, %v4001_v37 }
 0x150   : > { %3535 = vmatmul.mubr.msk.f32.vlgmr.msra.gmra.mxu1 %vm719_vm4, %v3987_v32  ;;  %v2559_v32 = vld [vmem:[#allocation2 + $0xda] sm:$0xff] }
 0x151   : > { %3613 = vmatmul.mubr.msk.f32.vlgmr.msra.gmra.mxu0 %vm719_vm4, %v4011_v43  ;;  %3585 = vmatpush3.msk.msra.mxu1 %vm831_vm2, %v749_v50 }
 0x152   : > { %3537 = vmatprep.mubr.msk.f32.mxu1 %vm719_vm4, %v4001_v37  ;;  %3615 = vmatprep.mubr.msk.f32.mxu0 %vm719_vm4, %v4021_v49  ;;  %v2558_v37 = vld [vmem:[#allocation2 + $0xca] sm:$0xff] }
 0x154   : > { %3538 = vmatmul.mubr.msk.f32.gmra.mxu1 %vm719_vm4, %v4011_v43  ;;  %v2560_v43 = vld [vmem:[#allocation2 + $0xe2] sm:$0xff] }
 0x155   : > { %3616 = vmatmul.mubr.msk.f32.gmra.mxu0 %vm719_vm4, %v4031_v55  ;;  %3540 = vmatprep.mubr.msk.f32.mxu1 %vm719_vm4, %v4021_v49 }
 0x156   : > { %3618 = vmatprep.mubr.msk.f32.mxu0 %vm719_vm4, %v4041_v60 }
 0x158   : > { %3541 = vmatmul.mubr.msk.f32.gmra.mxu1 %vm719_vm4, %v4031_v55 }
 0x159   : > { %3619 = vmatmul.mubr.msk.f32.gmra.mxu0 %vm719_vm4, %v4051_v2  ;;  %3543 = vmatprep.mubr.msk.f32.mxu1 %vm719_vm4, %v4041_v60 }
 0x15a   : > { %3621 = vmatprep.mubr.msk.f32.mxu0 %vm719_vm4, %v4061_v8 }
 0x15c   : > { %3544 = vmatmul.mubr.msk.f32.gmra.mxu1 %vm719_vm4, %v4051_v2 }
 0x15d   : > { %3622 = vmatmul.mubr.msk.f32.gmra.mxu0 %vm719_vm4, %v4070_v12  ;;  %3546 = vmatprep.mubr.msk.f32.mxu1 %vm719_vm4, %v4061_v8 }
 0x15e   : > { %3624 = vmatprep.mubr.msk.f32.mxu0 %vm719_vm4, %v4079_v14 }
 0x160   : > { %3547 = vmatmul.mubr.msk.f32.gmra.mxu1 %vm719_vm4, %v4070_v12 }
 0x161   : > { %3625 = vmatmul.mubr.msk.f32.gmra.mxu0 %vm719_vm4, %v4088_v16  ;;  %3549 = vmatprep.mubr.msk.f32.mxu1 %vm719_vm4, %v4079_v14 }
 0x162   : > { %3627 = vmatprep.mubr.msk.f32.mxu0 %vm719_vm4, %v4096_v18 }
 0x164   : > { %3550 = vmatmul.mubr.msk.f32.gmra.mxu1 %vm719_vm4, %v4088_v16 }
 0x165   : > { %3628 = vmatmul.mubr.msk.f32.gmra.mxu0 %vm719_vm4, %v4104_v22  ;;  %3552 = vmatprep.mubr.msk.f32.mxu1 %vm719_vm4, %v4096_v18 }
 0x166   : > { %3630 = vmatprep.mubr.msk.f32.mxu0 %vm719_vm4, %v2557_v27 }
 0x168   : > { %3553 = vmatmul.mubr.msk.f32.gmra.mxu1 %vm719_vm4, %v4104_v22 }
 0x169   : > { %3631 = vmatmul.mubr.msk.f32.gmra.mxu0 %vm719_vm4, %v2558_v37  ;;  %3555 = vmatprep.mubr.msk.f32.mxu1 %vm719_vm4, %v2557_v27 }
 0x16a   : > { %3633 = vmatprep.mubr.msk.f32.mxu0 %vm719_vm4, %v2559_v32 }
 0x16c   : > { %3556 = vmatmul.mubr.msk.f32.gmra.mxu1 %vm719_vm4, %v2558_v37 }
 0x16d   : > { %3634 = vmatmul.mubr.msk.f32.gmra.mxu0 %vm719_vm4, %v2560_v43  ;;  %3586 = vmatprep.mubr.msk.f32.mxu1 %vm719_vm4, %v3999_v36  ;;  %v2331_v36 = vld [vmem:[#allocation2 + $0xd9] sm:$0xff] }
 0x170   : > { %3587 = vmatmul.mubr.msk.f32.vlgmr.msra.gmra.mxu1 %vm719_vm4, %v4009_v42  ;;  %v2332_v42 = vld [vmem:[#allocation2 + $0xe1] sm:$0xff] }
 0x171   : > { %3589 = vmatprep.mubr.msk.f32.mxu1 %vm719_vm4, %v4019_v48 }
 0x174   : > { %3590 = vmatmul.mubr.msk.f32.gmra.mxu1 %vm719_vm4, %v4029_v54 }
 0x175   : > { %3592 = vmatprep.mubr.msk.f32.mxu1 %vm719_vm4, %v4039_v59 }
 0x178   : > { %3593 = vmatmul.mubr.msk.f32.gmra.mxu1 %vm719_vm4, %v4049_v1 }
 0x179   : > { %3595 = vmatprep.mubr.msk.f32.mxu1 %vm719_vm4, %v4059_v7 }
 0x17c   : > { %3596 = vmatmul.mubr.msk.f32.gmra.mxu1 %vm719_vm4, %v4068_v11 }
 0x17d   : > { %3598 = vmatprep.mubr.msk.f32.mxu1 %vm719_vm4, %v4077_v13 }
 0x180   : > { %3599 = vmatmul.mubr.msk.f32.gmra.mxu1 %vm719_vm4, %v4086_v15 }
 0x181   : > { %3601 = vmatprep.mubr.msk.f32.mxu1 %vm719_vm4, %v4094_v17 }
 0x184   : > { %3602 = vmatmul.mubr.msk.f32.gmra.mxu1 %vm719_vm4, %v4102_v19 }
 0x185   : > { %3604 = vmatprep.mubr.msk.f32.mxu1 %vm719_vm4, %v4161_v41 }
 0x188   : > { %3605 = vmatmul.mubr.msk.f32.gmra.mxu1 %vm719_vm4, %v4169_v46 }
 0x189   : > { %3607 = vmatprep.mubr.msk.f32.mxu1 %vm719_vm4, %v2331_v36 }
 0x18c   : > { %3608 = vmatmul.mubr.msk.f32.gmra.mxu1 %vm719_vm4, %v2332_v42 }
 0x1b0   : > { %v3406_v48 = vpop.f32.mrf.mxu1 }
 0x1b1   : > { %v3458_v49 = vpop.f32.mrf.mxu0 }
 0x1b2   : > { %v901_v54 = vpop.f32.mrf.mxu1 }
 0x1b3   : > { %v1309_v55 = vpop.f32.mrf.mxu0 }
 0x1b4   : > { %v3409_v57 = vpop.f32.mrf.mxu1 }
 0x1b5   : > { %v3461_v58 = vpop.f32.mrf.mxu0 }
 0x1b6   : > { %v911_v59 = vpop.f32.mrf.mxu1 }
 0x1b7   : > { %v1319_v60 = vpop.f32.mrf.mxu0 }
 0x1b8   : > { %v3412_v61 = vpop.f32.mrf.mxu1 }
 0x1b9   : > { %v3464_v62 = vpop.f32.mrf.mxu0 }
 0x1ba   : > { %v921_v63 = vpop.f32.mrf.mxu1 }
 0x1bb   : > { %v1329_v0 = vpop.f32.mrf.mxu0 }
 0x1bc   : > { %v3415_v1 = vpop.f32.mrf.mxu1 }
 0x1bd   : > { %v3467_v2 = vpop.f32.mrf.mxu0 }
 0x1be   : > { %v931_v3 = vpop.f32.mrf.mxu1 }
 0x1bf   : > { %v1339_v4 = vpop.f32.mrf.mxu0 }
 0x1c0   : > { %v3418_v5 = vpop.f32.mrf.mxu1 }
 0x1c1   : > { %v3470_v6 = vpop.f32.mrf.mxu0 }
 0x1c2   : > { %v941_v7 = vpop.f32.mrf.mxu1 }
 0x1c3   : > { %v1349_v8 = vpop.f32.mrf.mxu0 }
 0x1c4   : > { %v3421_v9 = vpop.f32.mrf.mxu1 }
 0x1c5   : > { %v3473_v10 = vpop.f32.mrf.mxu0 }
 0x1c6   : > { %v951_v11 = vpop.f32.mrf.mxu1 }
 0x1c7   : > { %v1359_v12 = vpop.f32.mrf.mxu0 }
 0x1c8   : > { %v3424_v26 = vpop.f32.mrf.mxu1 }
 0x1c9   : > { %v3476_v13 = vpop.f32.mrf.mxu0 }
 0x1ca   : > { %v961_v14 = vpop.f32.mrf.mxu1 }
 0x1cb   : > { %v4301_v15 = vpop.f32.mrf.mxu0 }
 0x1cc   : > { %v3427_v16 = vpop.f32.mrf.mxu1 }
 0x1cd   : > { %v4303_v17 = vpop.f32.mrf.mxu0 }
 0x1ce   : > { %v4305_v18 = vpop.f32.mrf.mxu1 }
 0x1cf   : > { %v4307_v19 = vpop.f32.mrf.mxu0 }
 0x1d0   : > { %v3432_v22 = vpop.f32.mrf.mxu1 }
 0x1d1   : > { %v4309_v28 = vpop.f32.mrf.mxu0  ;;  %v1103_v29 = vadd.f32 %v3432_v22, %v3406_v48 }
 0x1d2   : > { %v1097_v30 = vpop.f32.mrf.mxu1 }
 0x1d3   : > { %v4311_v24 = vpop.f32.mrf.mxu0  ;;  %v1098_v23 = vadd.f32 %v1097_v30, %v901_v54  ;;  %v4313_v25 = vadd.f32 %v3458_v49, %v1103_v29 }
 0x1d4   : > { %v3435_v20 = vpop.f32.mrf.mxu1 }
 0x1d5   : > { %v4315_v31 = vpop.f32.mrf.mxu0  ;;  %v1113_v21 = vadd.f32 %v3435_v20, %v3409_v57  ;;  %v4317_v33 = vadd.f32 %v1309_v55, %v1098_v23 }
 0x1d6   : > { %v1107_v34 = vpop.f32.mrf.mxu1 }
 0x1d7   : > { %v4319_v35 = vpop.f32.mrf.mxu0  ;;  %v1108_v38 = vadd.f32 %v1107_v34, %v911_v59  ;;  %v4321_v39 = vadd.f32 %v3461_v58, %v1113_v21 }
 0x1d8   : > { %v3438_v40 = vpop.f32.mrf.mxu1 }
 0x1d9   : > { %v4323_v41 = vpop.f32.mrf.mxu0  ;;  %v1123_v44 = vadd.f32 %v3438_v40, %v3412_v61  ;;  %v4325_v45 = vadd.f32 %v1319_v60, %v1108_v38 }
 0x1da   : > { %v1117_v46 = vpop.f32.mrf.mxu1 }
 0x1db   : > { %v4327_v47 = vpop.f32.mrf.mxu0  ;;  %v1118_v50 = vadd.f32 %v1117_v46, %v921_v63  ;;  %v4329_v51 = vadd.f32 %v3464_v62, %v1123_v44 }
 0x1dc   : > { %v3441_v52 = vpop.f32.mrf.mxu1 }
 0x1dd   : > { %v4331_v53 = vpop.f32.mrf.mxu0  ;;  %v1133_v56 = vadd.f32 %v3441_v52, %v3415_v1  ;;  %v4333_v27 = vadd.f32 %v1329_v0, %v1118_v50 }
 0x1de   : > { %v1127_v32 = vpop.f32.mrf.mxu1 }
 0x1df   : > { %v4335_v37 = vpop.f32.mrf.mxu0  ;;  %v1128_v43 = vadd.f32 %v1127_v32, %v931_v3  ;;  %v4337_v36 = vadd.f32 %v3467_v2, %v1133_v56 }
 0x1e0   : > { %v3444_v42 = vpop.f32.mrf.mxu1 }
 0x1e1   : > { %v4339_v48 = vpop.f32.mrf.mxu0  ;;  %v1143_v49 = vadd.f32 %v3444_v42, %v3418_v5  ;;  %v4341_v54 = vadd.f32 %v1339_v4, %v1128_v43 }
 0x1e2   : > { %v1137_v55 = vpop.f32.mrf.mxu1 }
 0x1e3   : > { %v4343_v57 = vpop.f32.mrf.mxu0  ;;  %v1138_v58 = vadd.f32 %v1137_v55, %v941_v7  ;;  %v4345_v59 = vadd.f32 %v3470_v6, %v1143_v49 }
 0x1e4   : > { %v3447_v60 = vpop.f32.mrf.mxu1 }
 0x1e5   : > { %v4347_v61 = vpop.f32.mrf.mxu0  ;;  %v1153_v62 = vadd.f32 %v3447_v60, %v3421_v9  ;;  %v4349_v63 = vadd.f32 %v1349_v8, %v1138_v58 }
 0x1e6   : > { %v1147_v0 = vpop.f32.mrf.mxu1 }
 0x1e7   : > { %v4351_v1 = vpop.f32.mrf.mxu0  ;;  %v1148_v2 = vadd.f32 %v1147_v0, %v951_v11  ;;  %v4353_v3 = vadd.f32 %v3473_v10, %v1153_v62 }
 0x1e8   : > { %v3450_v4 = vpop.f32.mrf.mxu1 }
 0x1e9   : > { %v4355_v5 = vpop.f32.mrf.mxu0  ;;  %v1163_v22 = vadd.f32 %v3450_v4, %v3424_v26  ;;  %v4357_v29 = vadd.f32 %v1359_v12, %v1148_v2 }
 0x1ea   : > { %4641 = vst [vmem:[#allocation3_spill] sm:$0xff] %v4355_v5  ;;  %v1157_v6 = vpop.f32.mrf.mxu1 }
 0x1eb   : > { %v4359_v7 = vpop.f32.mrf.mxu0  ;;  %v1158_v30 = vadd.f32 %v1157_v6, %v961_v14  ;;  %v4361_v23 = vadd.f32 %v3476_v13, %v1163_v22 }
 0x1ec   : > { %4642 = vst [vmem:[#allocation4_spill] sm:$0xff] %v4359_v7  ;;  %v3453_v8 = vpop.f32.mrf.mxu1 }
 0x1ed   : > { %v4363_v9 = vpop.f32.mrf.mxu0  ;;  %v1173_v20 = vadd.f32 %v3453_v8, %v3427_v16  ;;  %v4366_v11 = vadd.f32 %v4301_v15, %v1158_v30 }
 0x1ee   : > { %4643 = vst [vmem:[#allocation5_spill] sm:$0xff] %v4363_v9  ;;  %v1167_v10 = vpop.f32.mrf.mxu1 }
 0x1ef   : > { %v4368_v21 = vpop.f32.mrf.mxu0  ;;  %v1168_v26 = vadd.f32 %v1167_v10, %v4305_v18  ;;  %v4372_v12 = vadd.f32 %v4303_v17, %v1173_v20 }
 0x1f0   : > { %4644 = vst [vmem:[#allocation6_spill] sm:$0xff] %v4368_v21  ;;  %v3484_v34 = vpop.f32.mrf.mxu1 }
 0x1f1   : > { %v4374_v38 = vpop.f32.mrf.mxu0  ;;  %v4377_v13 = vadd.f32 %v4307_v19, %v1168_v26 }
 0x1f2   : > { %v1537_v14 = vpop.f32.mrf.mxu1 }
 0x1f3   : > { %v4379_v40 = vpop.f32.mrf.mxu0 }
 0x1f4   : > { %v3487_v16 = vpop.f32.mrf.mxu1 }
 0x1f5   : > { %v4381_v15 = vpop.f32.mrf.mxu0 }
 0x1f6   : > { %v1547_v44 = vpop.f32.mrf.mxu1 }
 0x1f7   : > { %v4383_v46 = vpop.f32.mrf.mxu0 }
 0x1f8   : > { %4645 = vst [vmem:[#allocation7_spill] sm:$0xff] %v4383_v46  ;;  %v3490_v50 = vpop.f32.mrf.mxu1  ;;  %v1617_v46 = vadd.f32 %v3484_v34, %v4313_v25 }
 0x1f9   : > { %v4385_v18 = vpop.f32.mrf.mxu0  ;;  %v1621_v25 = vadd.f32 %v3490_v50, %v4329_v51 }
 0x1fa   : > { %4646 = vst [vmem:[#allocation8_spill] sm:$0xff] %v4385_v18  ;;  %v1557_v17 = vpop.f32.mrf.mxu1 }
 0x1fb   : > { %v4387_v52 = vpop.f32.mrf.mxu0  ;;  %v1620_v34 = vadd.f32 %v1557_v17, %v4333_v27 }
 0x1fc   : > { %4647 = vst [vmem:[#allocation9_spill] sm:$0xff] %v4387_v52  ;;  %v3493_v56 = vpop.f32.mrf.mxu1 }
 0x1fd   : > { %v4389_v32 = vpop.f32.mrf.mxu0 }
 0x1fe   : > { %4648 = vst [vmem:[#allocation10_spill] sm:$0xff] %v4389_v32  ;;  %v1567_v19 = vpop.f32.mrf.mxu1 }
 0x1ff   : > { %v4391_v43 = vpop.f32.mrf.mxu0 }
 0x200   : > { %4649 = vst [vmem:[#allocation11_spill] sm:$0xff] %v4391_v43  ;;  %v3496_v42 = vpop.f32.mrf.mxu1 }
 0x201   : > { %v4393_v49 = vpop.f32.mrf.mxu0 }
 0x202   : > { %4650 = vst [vmem:[#allocation12_spill] sm:$0xff] %v4393_v49  ;;  %v1577_v55 = vpop.f32.mrf.mxu1 }
 0x203   : > { %v4395_v58 = vpop.f32.mrf.mxu0 }
 0x204   : > { %4651 = vst [vmem:[#allocation13_spill] sm:$0xff] %v4395_v58  ;;  %v3499_v60 = vpop.f32.mrf.mxu1 }
 0x205   : > { %v4397_v62 = vpop.f32.mrf.mxu0  ;;  %v1627_v51 = vadd.f32 %v3499_v60, %v4353_v3 }
 0x206   : > { %4652 = vst [vmem:[#allocation14_spill] sm:$0xff] %v4397_v62  ;;  %v1587_v0 = vpop.f32.mrf.mxu1 }
 0x207   : > { %v4399_v2 = vpop.f32.mrf.mxu0 }
 0x208   : > { %4653 = vst [vmem:[#allocation15_spill] sm:$0xff] %v4399_v2  ;;  %v3502_v4 = vpop.f32.mrf.mxu1 }
 0x209   : > { %v4401_v22 = vpop.f32.mrf.mxu0 }
 0x20a   : > { %4654 = vst [vmem:[#allocation16_spill] sm:$0xff] %v4401_v22  ;;  %v1597_v6 = vpop.f32.mrf.mxu1 }
 0x20b   : > { %v4403_v30 = vpop.f32.mrf.mxu0 }
 0x20c   : > { %4655 = vst [vmem:[#allocation17_spill] sm:$0xff] %v4403_v30  ;;  %v4405_v8 = vpop.f32.mrf.mxu1 }
 0x20d   : > { %v4407_v20 = vpop.f32.mrf.mxu0 }
 0x20e   : > { %4656 = vst [vmem:[#allocation18_spill] sm:$0xff] %v4407_v20  ;;  %v4409_v10 = vpop.f32.mrf.mxu1 }
 0x20f   : > { %v4411_v26 = vpop.f32.mrf.mxu0 }
 0x210   : > { %4657 = vst [vmem:[#allocation19_spill] sm:$0xff] %v4411_v26  ;;  %v3536_v58 = vpop.f32.mrf.mxu1 }
 0x211   : > { %v3614_v62 = vpop.f32.mrf.mxu0 }
 0x212   : > { %v1993_v49 = vpop.f32.mrf.mxu1 }
 0x213   : > { %v4413_v2 = vpop.f32.mrf.mxu0 }
 0x214   : > { %v3539_v43 = vpop.f32.mrf.mxu1  ;;  %4658 = vst [vmem:[#allocation20_spill] sm:$0xff] %v4413_v2 }
 0x215   : > { %v4417_v18 = vpop.f32.mrf.mxu0 }
 0x216   : > { %v2003_v32 = vpop.f32.mrf.mxu1  ;;  %4660 = vst [vmem:[#allocation22_spill] sm:$0xff] %v4417_v18  ;;  %v1616_v18 = vadd.f32 %v1537_v14, %v4317_v33  ;;  %v1623_v33 = vadd.f32 %v3493_v56, %v4337_v36 }
 0x217   : > { %v4423_v20 = vpop.f32.mrf.mxu0 }
 0x218   : > { %v3542_v52 = vpop.f32.mrf.mxu1  ;;  %4663 = vst [vmem:[#allocation25_spill] sm:$0xff] %v4423_v20  ;;  %v1619_v20 = vadd.f32 %v3487_v16, %v4321_v39  ;;  %v1622_v39 = vadd.f32 %v1567_v19, %v4341_v54  ;;  %v1849_v54 = vadd.f32 %v4323_v41, %v1621_v25 }
 0x219   : > { %v4429_v7 = vpop.f32.mrf.mxu0 }
 0x21a   : > { %v4415_v22 = vpop.f32.mrf.mxu1  ;;  %4666 = vst [vmem:[#allocation28_spill] sm:$0xff] %v4429_v7  ;;  %v1618_v7 = vadd.f32 %v1547_v44, %v4325_v45  ;;  %v1847_v16 = vadd.f32 %v4315_v31, %v1619_v20  ;;  %v1625_v45 = vadd.f32 %v3496_v42, %v4345_v59  ;;  %v1851_v31 = vadd.f32 %v4331_v53, %v1623_v33 }
 0x21b   : > { %4659 = vst [vmem:[#allocation21_spill] sm:$0xff] %v4415_v22  ;;  %v4437_v22 = vpop.f32.mrf.mxu0  ;;  %v4669_v42 = vld [vmem:[#allocation20_spill] sm:$0xff] }
 0x21c   : > { %v4419_v30 = vpop.f32.mrf.mxu1  ;;  %v2075_v27 = vadd.f32 %v3539_v43, %v1847_v16  ;;  %v1846_v36 = vadd.f32 %v4319_v35, %v1618_v7  ;;  %v1629_v35 = vadd.f32 %v3502_v4, %v4361_v23  ;;  %v1628_v7 = vadd.f32 %v1597_v6, %v4366_v11  ;;  %v4678_v16 = vld [vmem:[#allocation6_spill] sm:$0xff] }
 0x21d   : > { %4661 = vst [vmem:[#allocation23_spill] sm:$0xff] %v4419_v30  ;;  %v4450_v14 = vpop.f32.mrf.mxu0  ;;  %v1631_v23 = vadd.f32 %v4405_v8, %v4372_v12  ;;  %v2077_v11 = vadd.f32 %v3542_v52, %v1849_v54  ;;  %v4675_v20 = vld [vmem:[#allocation22_spill] sm:$0xff] }
 0x21e   : > { %v4421_v21 = vpop.f32.mrf.mxu1  ;;  %v2074_v50 = vadd.f32 %v2003_v32, %v1846_v36 }
 0x21f   : > { %4662 = vst [vmem:[#allocation24_spill] sm:$0xff] %v4421_v21  ;;  %v4467_v59 = vpop.f32.mrf.mxu0  ;;  %v4680_v54 = vld [vmem:[#allocation25_spill] sm:$0xff] }
 0x220   : > { %v4425_v9 = vpop.f32.mrf.mxu1 }
 0x221   : > { %4664 = vst [vmem:[#allocation26_spill] sm:$0xff] %v4425_v9  ;;  %v1845_v9 = vadd.f32 %v4309_v28, %v1617_v46  ;;  %v1626_v46 = vadd.f32 %v1587_v0, %v4357_v29  ;;  %v1853_v29 = vadd.f32 %v4339_v48, %v1625_v45  ;;  %v1630_v48 = vadd.f32 %v4409_v10, %v4377_v13  ;;  %v4673_v0 = vld [vmem:[#allocation3_spill] sm:$0xff]  ;;  %v4674_v13 = vld [vmem:[#allocation4_spill] sm:$0xff] }
 0x222   : > { %v4427_v26 = vpop.f32.mrf.mxu1  ;;  %v4495_v4 = vadd.f32 %v4673_v0, %v1629_v35  ;;  %v4498_v52 = vadd.f32 %v4674_v13, %v1628_v7  ;;  %v4683_v35 = vld [vmem:[#allocation10_spill] sm:$0xff] }
 0x223   : > { %4665 = vst [vmem:[#allocation27_spill] sm:$0xff] %v4427_v26  ;;  %v2073_v26 = vadd.f32 %v3536_v58, %v1845_v9  ;;  %v1624_v9 = vadd.f32 %v1577_v55, %v4349_v63  ;;  %v1854_v32 = vadd.f32 %v4351_v1, %v1626_v46  ;;  %v4670_v55 = vld [vmem:[#allocation7_spill] sm:$0xff]  ;;  %v4509_v45 = vadd.f32 %v4678_v16, %v1630_v48 }
 0x224   : > { %v4431_v5 = vpop.f32.mrf.mxu1  ;;  %v2303_v58 = vadd.f32 %v4670_v55, %v2074_v50 }
 0x225   : > { %4667 = vst [vmem:[#allocation29_spill] sm:$0xff] %v4431_v5  ;;  %v1844_v5 = vadd.f32 %v4311_v24, %v1616_v18  ;;  %v2302_v44 = vadd.f32 %v4374_v38, %v2073_v26  ;;  %v1850_v18 = vadd.f32 %v4335_v37, %v1622_v39  ;;  %v1852_v41 = vadd.f32 %v4343_v57, %v1624_v9  ;;  %v4486_v57 = vpop.f32.mrf.mxu0  ;;  %v4677_v39 = vld [vmem:[#allocation5_spill] sm:$0xff]  ;;  %v4679_v9 = vld [vmem:[#allocation8_spill] sm:$0xff] }
 0x226   : > { %v4434_v2 = vpop.f32.mrf.mxu1  ;;  %v1855_v38 = vadd.f32 %v4347_v61, %v1627_v51  ;;  %v4676_v25 = vld [vmem:[#allocation24_spill] sm:$0xff]  ;;  %v2306_v51 = vadd.f32 %v4679_v9, %v2077_v11 }
 0x227   : > { %v2072_v28 = vadd.f32 %v1993_v49, %v1844_v5  ;;  %v1848_v5 = vadd.f32 %v4327_v47, %v1620_v34  ;;  %v4478_v47 = vld [vmem:[%s4635_s6] ss:$0 sm:$0xff]  ;;  %v2078_v34 = vadd.f32 %v4676_v25, %v1850_v18  ;;  %v4503_v33 = vpop.f32.mrf.mxu0  ;;  %v2082_v16 = vadd.f32 %v4434_v2, %v1854_v32 }
 0x228   : > { %v4439_v30 = vpop.f32.mrf.mxu1  ;;  %v4682_v18 = vld [vmem:[#allocation9_spill] sm:$0xff] }
 0x229   : > { %4668 = vst [vmem:[#allocation30_spill] sm:$0xff] %v4439_v30  ;;  %v2301_v17 = vadd.f32 %v4379_v40, %v2072_v28  ;;  %v2304_v40 = vadd.f32 %v4381_v15, %v2075_v27  ;;  %v4671_v15 = vld [vmem:[#allocation21_spill] sm:$0xff]  ;;  %v4506_v28 = vadd.f32 %v4677_v39, %v1631_v23 }
 0x22a   : > { %v4443_v21 = vpop.f32.mrf.mxu1  ;;  %v2076_v60 = vadd.f32 %v4671_v15, %v1848_v5  ;;  %v4684_v48 = vld [vmem:[#allocation27_spill] sm:$0xff] }
 0x22b   : > { %v2080_v11 = vadd.f32 %v4684_v48, %v1852_v41  ;;  %v4692_v48 = vld [vmem:[#allocation15_spill] sm:$0xff] }
 0x22c   : > { %v4452_v30 = vpop.f32.mrf.mxu1  ;;  %v4687_v0 = vld [vmem:[#allocation29_spill] sm:$0xff] }
 0x22d   : > { %v2083_v13 = vadd.f32 %v4687_v0, %v1855_v38 }
 0x22e   : > { %v4458_v24 = vpop.f32.mrf.mxu1 }
 0x230   : > { %v3588_v63 = vpop.f32.mrf.mxu1  ;;  %v4690_v2 = vld [vmem:[#allocation30_spill] sm:$0xff] }
 0x231   : > { %v2530_v3 = vadd.f32 %v3588_v63, %v2302_v44  ;;  %v2085_v32 = vadd.f32 %v4690_v2, %v4495_v4  ;;  %v3683_v4 = vld [vmem:[%s3824_s19 + $0x28] sm:$0xff] }
 0x232   : > { %v2450_v53 = vpop.f32.mrf.mxu1 }
 0x233   : > { %v2758_v37 = vadd.f32 %v3614_v62, %v2530_v3  ;;  %v2529_v56 = vadd.f32 %v2450_v53, %v2301_v17  ;;  %v4672_v62 = vld [vmem:[#allocation23_spill] sm:$0xff]  ;;  %v2305_v3 = vadd.f32 %v4682_v18, %v2076_v60  ;;  %v3679_v53 = vld [vmem:[%s3824_s19 + $0x8] sm:$0xff] }
 0x234   : > { %v3591_v19 = vpop.f32.mrf.mxu1  ;;  %v2079_v12 = vadd.f32 %v4672_v62, %v1851_v31  ;;  %v4681_v31 = vld [vmem:[#allocation26_spill] sm:$0xff] }
 0x235   : > { %v2780_v43 = vadd.f32 %v4478_v47, %v2758_v37  ;;  %v2757_v61 = vadd.f32 %v4669_v42, %v2529_v56  ;;  %v2532_v49 = vadd.f32 %v3591_v19, %v2304_v40  ;;  %v2081_v63 = vadd.f32 %v4681_v31, %v1853_v29  ;;  %v4527_v19 = vpop.f32.mrf.mxu0  ;;  %v4691_v18 = vld [vmem:[#allocation14_spill] sm:$0xff] }
 0x236   : > { %v2460_v1 = vpop.f32.mrf.mxu1  ;;  %v2308_v7 = vadd.f32 %v4683_v35, %v2079_v12 }
 0x237   : > { %v2796_v6 = vmul.f32 0.1, %v2780_v43  ;;  %v2779_v8 = vadd.f32 %v4478_v47, %v2757_v61  ;;  %v2760_v10 = vadd.f32 %v4675_v20, %v2532_v49  ;;  %v2531_v26 = vadd.f32 %v2460_v1, %v2303_v58  ;;  %v4686_v49 = vld [vmem:[#allocation11_spill] sm:$0xff]  ;;  %v3680_v58 = vld [vmem:[%s3824_s19] sm:$0xff]  ;;  %v2728_v38 = vpop.f32.mrf.mxu0 }
 0x238   : > { %v3594_v27 = vpop.f32.mrf.mxu1  ;;  %v2307_v55 = vadd.f32 %v4686_v49, %v2078_v34 }
 0x239   : > { %v2812_v36 = vmax.f32 %v2780_v43, %v2796_v6  ;;  %v2795_v44 = vmul.f32 0.1, %v2779_v8  ;;  %v2782_v46 = vadd.f32 %v4478_v47, %v2760_v10  ;;  %v2759_v5 = vadd.f32 %v4680_v54, %v2531_v26  ;;  %v4685_v43 = vld [vmem:[#allocation28_spill] sm:$0xff] }
 0x23a   : > { %v2534_v50 = vadd.f32 %v3594_v27, %v2306_v51  ;;  %v2470_v17 = vpop.f32.mrf.mxu1  ;;  %v3681_v10 = vld [vmem:[%s3824_s19 + $0x18] sm:$0xff]  ;;  %v4689_v27 = vld [vmem:[#allocation13_spill] sm:$0xff] }
 0x23b   : > { %v2828_v37 = vadd.f32 %v3679_v53, %v2812_v36  ;;  %v2811_v56 = vmax.f32 %v2779_v8, %v2795_v44  ;;  %v2798_v40 = vmul.f32 0.1, %v2782_v46  ;;  %v2781_v23 = vadd.f32 %v4478_v47, %v2759_v5  ;;  %v4688_v8 = vld [vmem:[#allocation12_spill] sm:$0xff]  ;;  %v3682_v44 = vld [vmem:[%s3824_s19 + $0x10] sm:$0xff] }
 0x23c   : > { %v2762_v29 = vadd.f32 %v4685_v43, %v2534_v50  ;;  %v2533_v42 = vadd.f32 %v2470_v17, %v2305_v3  ;;  %v3597_v61 = vpop.f32.mrf.mxu1  ;;  %v2310_v20 = vadd.f32 %v4688_v8, %v2081_v63  ;;  %v2309_v36 = vadd.f32 %v4689_v27, %v2080_v11 }
 0x23d   : > { %2844 = vst.msk [vmem:[%s4519_s25 + $0x8] sm:$0xff] %vm420_vm0, %v2828_v37  ;;  %v2827_v15 = vadd.f32 %v3680_v58, %v2811_v56  ;;  %v2814_v60 = vmax.f32 %v2782_v46, %v2798_v40  ;;  %v2797_v62 = vmul.f32 0.1, %v2781_v23  ;;  %v2536_v12 = vadd.f32 %v3597_v61, %v2308_v7  ;;  %v4693_v58 = vld [vmem:[#allocation16_spill] sm:$0xff] }
 0x23e   : > { %v2784_v41 = vadd.f32 %v4478_v47, %v2762_v29  ;;  %v2761_v1 = vadd.f32 %v4437_v22, %v2533_v42  ;;  %v2480_v6 = vpop.f32.mrf.mxu1  ;;  %v2312_v3 = vadd.f32 %v4691_v18, %v2083_v13  ;;  %v2084_v37 = vadd.f32 %v4443_v21, %v4498_v52  ;;  %v3684_v21 = vld [vmem:[%s3824_s19 + $0x20] sm:$0xff] }
 0x23f   : > { %2843 = vst.msk [vmem:[%s4519_s25] sm:$0xff] %vm420_vm0, %v2827_v15  ;;  %v2830_v26 = vadd.f32 %v3681_v10, %v2814_v60  ;;  %v2813_v25 = vmax.f32 %v2781_v23, %v2797_v62  ;;  %v2764_v34 = vadd.f32 %v4450_v14, %v2536_v12  ;;  %v2535_v39 = vadd.f32 %v2480_v6, %v2307_v55  ;;  %v3685_v60 = vld [vmem:[%s3824_s19 + $0x38] sm:$0xff]  ;;  %v4694_v6 = vld [vmem:[#allocation17_spill] sm:$0xff] }
 0x240   : > { %v2800_v9 = vmul.f32 0.1, %v2784_v41  ;;  %v2783_v51 = vadd.f32 %v4478_v47, %v2761_v1  ;;  %v3600_v22 = vpop.f32.mrf.mxu1  ;;  %v2311_v11 = vadd.f32 %v4692_v48, %v2082_v16  ;;  %v2314_v15 = vadd.f32 %v4693_v58, %v2085_v32  ;;  %v4695_v16 = vld [vmem:[#allocation18_spill] sm:$0xff] }
 0x241   : > { %2846 = vst.msk [vmem:[%s4519_s25 + $0x18] sm:$0xff] %vm420_vm0, %v2830_v26  ;;  %v2829_v46 = vadd.f32 %v3682_v44, %v2813_v25  ;;  %v2786_v54 = vadd.f32 %v4478_v47, %v2764_v34  ;;  %v2763_v14 = vadd.f32 %v4467_v59, %v2535_v39  ;;  %v2538_v5 = vadd.f32 %v3600_v22, %v2310_v20  ;;  %v3632_v59 = vpop.f32.mrf.mxu0  ;;  %v3686_v20 = vld [vmem:[%s3824_s19 + $0x30] sm:$0xff] }
 0x242   : > { %v2816_v31 = vmax.f32 %v2784_v41, %v2800_v9  ;;  %v2799_v63 = vmul.f32 0.1, %v2783_v51  ;;  %v2490_v50 = vpop.f32.mrf.mxu1  ;;  %v2313_v8 = vadd.f32 %v4694_v6, %v2084_v37 }
 0x243   : > { %2845 = vst.msk [vmem:[%s4519_s25 + $0x10] sm:$0xff] %vm420_vm0, %v2829_v46  ;;  %v2802_v17 = vmul.f32 0.1, %v2786_v54  ;;  %v2785_v35 = vadd.f32 %v4478_v47, %v2763_v14  ;;  %v2766_v7 = vadd.f32 %v4486_v57, %v2538_v5  ;;  %v2537_v53 = vadd.f32 %v2490_v50, %v2309_v36  ;;  %v4696_v5 = vld [vmem:[#allocation19_spill] sm:$0xff] }
 0x244   : > { %v2832_v56 = vadd.f32 %v3683_v4, %v2816_v31  ;;  %v2815_v40 = vmax.f32 %v2783_v51, %v2799_v63  ;;  %v3603_v23 = vpop.f32.mrf.mxu1  ;;  %v2087_v57 = vadd.f32 %v4452_v30, %v4506_v28  ;;  %v2086_v30 = vadd.f32 %v4458_v24, %v4509_v45  ;;  %v3689_v4 = vld [vmem:[%s3824_s19 + $0x58] sm:$0xff] }
 0x245   : > { %v2818_v43 = vmax.f32 %v2786_v54, %v2802_v17  ;;  %v2801_v29 = vmul.f32 0.1, %v2785_v35  ;;  %v2788_v42 = vadd.f32 %v4478_v47, %v2766_v7  ;;  %v2765_v61 = vadd.f32 %v4503_v33, %v2537_v53  ;;  %v2738_v33 = vpop.f32.mrf.mxu0 }
 0x246   : > { %2848 = vst.msk [vmem:[%s4519_s25 + $0x28] sm:$0xff] %vm420_vm0, %v2832_v56  ;;  %v2831_v52 = vadd.f32 %v3684_v21, %v2815_v40  ;;  %v2540_v49 = vadd.f32 %v3603_v23, %v2312_v3  ;;  %v2500_v55 = vpop.f32.mrf.mxu1  ;;  %v2316_v9 = vadd.f32 %v4695_v16, %v2087_v57  ;;  %v2315_v2 = vadd.f32 %v4696_v5, %v2086_v30 }
 0x247   : > { %v2834_v62 = vadd.f32 %v3685_v60, %v2818_v43  ;;  %v2817_v12 = vmax.f32 %v2785_v35, %v2801_v29  ;;  %v2804_v0 = vmul.f32 0.1, %v2788_v42  ;;  %v2787_v13 = vadd.f32 %v4478_v47, %v2765_v61  ;;  %v3635_v44 = vpop.f32.mrf.mxu0  ;;  %v3690_v29 = vld [vmem:[%s3824_s19 + $0x50] sm:$0xff]  ;;  %v3691_v61 = vld [vmem:[%s3824_s19 + $0x68] sm:$0xff] }
 0x248   : > { %2847 = vst.msk [vmem:[%s4519_s25 + $0x20] sm:$0xff] %vm420_vm0, %v2831_v52  ;;  %v2768_v28 = vadd.f32 %v4527_v19, %v2540_v49  ;;  %v2539_v41 = vadd.f32 %v2500_v55, %v2311_v11  ;;  %v3606_v1 = vpop.f32.mrf.mxu1  ;;  %v3687_v19 = vld [vmem:[%s3824_s19 + $0x48] sm:$0xff]  ;;  %v3692_v55 = vld [vmem:[%s3824_s19 + $0x60] sm:$0xff] }
 0x249   : > { %2850 = vst.msk [vmem:[%s4519_s25 + $0x38] sm:$0xff] %vm420_vm0, %v2834_v62  ;;  %v2833_v10 = vadd.f32 %v3686_v20, %v2817_v12  ;;  %v2820_v26 = vmax.f32 %v2788_v42, %v2804_v0  ;;  %v2803_v25 = vmul.f32 0.1, %v2787_v13  ;;  %v2542_v34 = vadd.f32 %v3606_v1, %v2314_v15  ;;  %v2748_v37 = vpop.f32.mrf.mxu0  ;;  %v3693_v62 = vld [vmem:[%s3824_s19 + $0x78] sm:$0xff] }
 0x24a   : > { %v2790_v24 = vadd.f32 %v4478_v47, %v2768_v28  ;;  %v2767_v45 = vadd.f32 %v2728_v38, %v2539_v41  ;;  %v2510_v39 = vpop.f32.mrf.mxu1  ;;  %v3688_v38 = vld [vmem:[%s3824_s19 + $0x40] sm:$0xff] }
 0x24b   : > { %2849 = vst.msk [vmem:[%s4519_s25 + $0x30] sm:$0xff] %vm420_vm0, %v2833_v10  ;;  %v2836_v51 = vadd.f32 %v3687_v19, %v2820_v26  ;;  %v2819_v22 = vmax.f32 %v2787_v13, %v2803_v25  ;;  %v2770_v27 = vadd.f32 %v3632_v59, %v2542_v34  ;;  %v2541_v36 = vadd.f32 %v2510_v39, %v2313_v8  ;;  %v3694_v13 = vld [vmem:[%s3824_s19 + $0x70] sm:$0xff] }
 0x24c   : > { %v2806_v46 = vmul.f32 0.1, %v2790_v24  ;;  %v2789_v54 = vadd.f32 %v4478_v47, %v2767_v45  ;;  %v3609_v14 = vpop.f32.mrf.mxu1 }
 0x24d   : > { %2852 = vst.msk [vmem:[%s4519_s25 + $0x48] sm:$0xff] %vm420_vm0, %v2836_v51  ;;  %v2835_v32 = vadd.f32 %v3688_v38, %v2819_v22  ;;  %v2792_v31 = vadd.f32 %v4478_v47, %v2770_v27  ;;  %v2769_v63 = vadd.f32 %v2738_v33, %v2541_v36  ;;  %v2544_v50 = vadd.f32 %v3609_v14, %v2316_v9 }
 0x24e   : > { %v2822_v18 = vmax.f32 %v2790_v24, %v2806_v46  ;;  %v2805_v3 = vmul.f32 0.1, %v2789_v54  ;;  %v2520_v17 = vpop.f32.mrf.mxu1 }
 0x24f   : > { %2851 = vst.msk [vmem:[%s4519_s25 + $0x40] sm:$0xff] %vm420_vm0, %v2835_v32  ;;  %v2808_v35 = vmul.f32 0.1, %v2792_v31  ;;  %v2791_v7 = vadd.f32 %v4478_v47, %v2769_v63  ;;  %v2772_v53 = vadd.f32 %v3635_v44, %v2544_v50  ;;  %v2543_v59 = vadd.f32 %v2520_v17, %v2315_v2 }
 0x250   : > { %v2838_v56 = vadd.f32 %v3689_v4, %v2822_v18  ;;  %v2821_v40 = vmax.f32 %v2789_v54, %v2805_v3 }
 0x251   : > { %v2824_v23 = vmax.f32 %v2792_v31, %v2808_v35  ;;  %v2807_v48 = vmul.f32 0.1, %v2791_v7  ;;  %v2794_v11 = vadd.f32 %v4478_v47, %v2772_v53  ;;  %v2771_v43 = vadd.f32 %v2748_v37, %v2543_v59 }
 0x252   : > { %2854 = vst.msk [vmem:[%s4519_s25 + $0x58] sm:$0xff] %vm420_vm0, %v2838_v56  ;;  %v2837_v42 = vadd.f32 %v3690_v29, %v2821_v40 }
 0x253   : > { %v2840_v57 = vadd.f32 %v3691_v61, %v2824_v23  ;;  %v2823_v21 = vmax.f32 %v2791_v7, %v2807_v48  ;;  %v2810_v52 = vmul.f32 0.1, %v2794_v11  ;;  %v2793_v49 = vadd.f32 %v4478_v47, %v2771_v43 }
 0x254   : > { %2853 = vst.msk [vmem:[%s4519_s25 + $0x50] sm:$0xff] %vm420_vm0, %v2837_v42 }
 0x255   : > { %2856 = vst.msk [vmem:[%s4519_s25 + $0x68] sm:$0xff] %vm420_vm0, %v2840_v57  ;;  %v2839_v58 = vadd.f32 %v3692_v55, %v2823_v21  ;;  %v2826_v15 = vmax.f32 %v2794_v11, %v2810_v52  ;;  %v2809_v60 = vmul.f32 0.1, %v2793_v49 }
 0x257   : > { %2855 = vst.msk [vmem:[%s4519_s25 + $0x60] sm:$0xff] %vm420_vm0, %v2839_v58  ;;  %v2842_v12 = vadd.f32 %v3693_v62, %v2826_v15  ;;  %v2825_v0 = vmax.f32 %v2793_v49, %v2809_v60 }
 0x259   : > { %2858 = vst.msk [vmem:[%s4519_s25 + $0x78] sm:$0xff] %vm420_vm0, %v2842_v12  ;;  %v2841_v33 = vadd.f32 %v3694_v13, %v2825_v0 }
 0x25b   : > { %2857 = vst.msk [vmem:[%s4519_s25 + $0x70] sm:$0xff] %vm420_vm0, %v2841_v33 }
 0x25c PF: > { %s17_s28 = sadd.s32 1, %s3733_s28   ;;  %s4697_s24 = smov %s3725_s26 }
 0x25d   : > { %p14_p9 = scmp.ge.s32.totalorder %s17_s28, 6   ;;  %s4698_s25 = smov %s3729_s27 }
 0x25e   : > { %s4699_s26 = smov %s4702_s29  ;;  %s4700_s27 = smov %s4706_s30 }
 0x25f   :  { %16 = sbr.rel (!%p14_p9) target bundleno = 3 (0x3), region = 87 }

</bundles_post_ra>
